<compile_context>
chip_gen: v7x
topology: tpu7x:2x2x1
jax: 0.10.0
libtpu: 0.0.40
codegen_flags: <defaults>
</compile_context>

<pallas_src>
import math
import jax
import jax.numpy as jnp
from jax.experimental import pallas as pl
from jax.experimental.pallas import tpu as pltpu

_SQRT2_INV = 0.7071067811865476


def _gelu_erf(x):
    # GELU(x) = 0.5*x*(1+erf(x/sqrt(2))) using Abramowitz & Stegun 7.1.26 erf
    # (|err| < 1.5e-7) -> matches torch.nn.GELU() (exact erf form) well inside
    # the f32 tolerance.  The reciprocal is an EUP approx seed + one Newton
    # step: cheaper than a full f32 divide over the (TM, N, F) slab while the
    # residual error is O(eps^2), i.e. numerically exact.
    a1, a2, a3, a4, a5 = (0.254829592, -0.284496736, 1.421413741,
                          -1.453152027, 1.061405429)
    pc = 0.3275911
    u = x * _SQRT2_INV
    sign = jnp.where(u < 0.0, -1.0, 1.0)
    au = jnp.abs(u)
    d = 1.0 + pc * au
    t = pl.reciprocal(d, approx=True)      # EUP slot (free-ish)
    t = t * (2.0 - d * t)                  # one Newton refinement
    poly = ((((a5 * t + a4) * t + a3) * t + a2) * t + a1) * t
    erf_u = sign * (1.0 - poly * jnp.exp(-au * au))
    return 0.5 * x * (1.0 + erf_u)


# ----------------------------------------------------------------------------
# Pallas kernel: one (head, query-row-tile) per grid step
# ----------------------------------------------------------------------------
def _gat_head_kernel(xq_ref, xk_ref, ef_ref, mask_ref,
                     w1_ref, b1_ref, wa1i_ref, wa1j_ref, wa1e_ref, ba1_ref,
                     wa2_ref, ba2_ref, ln2g_ref, ln2b_ref, out_ref):
    eps = 1e-5
    TM, N = mask_ref.shape
    F = wa1i_ref.shape[-1]

    # Linear(Din, p) with the (head-invariant) LayerNorm affine pre-folded into
    # W1'/b1' in glue; xq/xk are the pre-normalized node features.
    w1 = w1_ref[0]                                            # (Din, p)
    b1 = b1_ref[0]                                            # (1, p)
    h_q = jnp.dot(xq_ref[...], w1, preferred_element_type=jnp.float32) + b1   # (TM, p)
    h_k = jnp.dot(xk_ref[...], w1, preferred_element_type=jnp.float32) + b1   # (N,  p)

    # attention MLP first layer, with Wa1 pre-split in glue (no in-kernel
    # sublane slices) and the edge contribution as a single MXU matmul.
    a_i = jnp.dot(h_q, wa1i_ref[0], preferred_element_type=jnp.float32)       # (TM, F)
    b_j = jnp.dot(h_k, wa1j_ref[0], preferred_element_type=jnp.float32)       # (N,  F)
    e_z = jnp.dot(ef_ref[...], wa1e_ref[0],
                  preferred_element_type=jnp.float32)                         # (TM*N, F)
    e_z = e_z.reshape(TM, N, F)

    z = a_i[:, None, :] + b_j[None, :, :] + e_z + ba1_ref[0][None]            # (TM, N, F)
    z = _gelu_erf(z)

    # second attention linear to a scalar score
    score = jnp.sum(z * wa2_ref[0][None], axis=-1) + ba2_ref[0]               # (TM, N)

    # LeakyReLU(0.2), then additive adjacency mask (0 / -1e12, precomputed)
    score = jnp.where(score > 0.0, score, 0.2 * score)
    score = score + mask_ref[...]

    # softmax along the key axis; one tiny exact divide on the (TM, 1)
    # denominator + broadcast multiply instead of N^2 divides.
    score = score - jnp.max(score, axis=-1, keepdims=True)
    escore = jnp.exp(score)
    inv_den = 1.0 / jnp.sum(escore, axis=-1, keepdims=True)                   # (TM, 1)
    attn = escore * inv_den

    # aggregate + last LayerNorm(p)
    o = jnp.dot(attn, h_k, preferred_element_type=jnp.float32)                # (TM, p)
    mu2 = jnp.mean(o, axis=-1, keepdims=True)
    var2 = jnp.mean((o - mu2) ** 2, axis=-1, keepdims=True)
    on = (o - mu2) * jax.lax.rsqrt(var2 + eps)
    on = on * ln2g_ref[0] + ln2b_ref[0]

    out_ref[...] = on[None].astype(out_ref.dtype)


# ----------------------------------------------------------------------------
# JAX glue
# ----------------------------------------------------------------------------
def normalize_adjacent_matrix(adj):
    a = adj + jnp.eye(adj.shape[-1], dtype=adj.dtype)
    degree = 1.0 / jnp.sqrt(jnp.sum(a, axis=-1))
    degree = jnp.where(jnp.isnan(degree), jnp.zeros_like(degree), degree)
    return degree[..., :, None] * a * degree[..., None, :]


def gat_layer_pallas(node_features, edge_features, node_adjacent, params, *,
                     row_tile=None):
    H, Din, p = params["W1"].shape
    N = node_features.shape[0]
    E = edge_features.shape[-1]
    F = 2 * p + E

    if row_tile is None:
        row_tile = N if N <= 128 else 128
    assert N % row_tile == 0, "row_tile must divide N"
    TM = row_tile
    # TODO(synk): for very large N, budget TM against per-generation VMEM
    # (64 MiB on v7x vs 128 MiB on v5e/v6e) and set vmem_limit_bytes explicitly.

    # --- head-invariant preprocessing (done once, not once per head) ---------
    x = node_features.astype(jnp.float32)
    mu = jnp.mean(x, axis=-1, keepdims=True)
    var = jnp.mean((x - mu) ** 2, axis=-1, keepdims=True)
    xn = (x - mu) * jax.lax.rsqrt(var + 1e-5)                  # LN without affine

    adj1 = normalize_adjacent_matrix(node_adjacent.astype(jnp.float32))
    mask = jnp.where(adj1 > 0, 0.0, -1e12).astype(jnp.float32)  # additive mask

    ef2 = edge_features.astype(jnp.float32).reshape(N * N, E)   # for MXU matmul

    # fold LN affine into the per-head Linear: (xn*g + b) @ W1 + b1
    #   = xn @ (g[:,None]*W1) + (b @ W1 + b1)
    W1p = params["ln1_g"][:, 0, :, None] * params["W1"]                       # (H, Din, p)
    b1p = (params["b1"][:, 0, :] +
           jnp.einsum("hd,hdp->hp", params["ln1_b"][:, 0, :], params["W1"]))
    b1p = b1p[:, None, :]                                                      # (H, 1, p)

    # pre-split Wa1 so the kernel never sublane-slices it
    Wa1 = params["Wa1"]                                                        # (H, F, F)
    Wa1_i = Wa1[:, :p, :]                                                      # (H, p, F)
    Wa1_j = Wa1[:, p:2 * p, :]                                                 # (H, p, F)
    Wa1_e = Wa1[:, 2 * p:, :]                                                  # (H, E, F)

    def head3(shp):
        return pl.BlockSpec((1,) + shp, lambda h, i: (h, 0, 0))

    out = pl.pallas_call(
        _gat_head_kernel,
        out_shape=jax.ShapeDtypeStruct((H, N, p), jnp.float32),
        grid=(H, N // TM),
        in_specs=[
            pl.BlockSpec((TM, Din), lambda h, i: (i, 0)),       # xn (query rows)
            pl.BlockSpec((N, Din), lambda h, i: (0, 0)),        # xn (all nodes)
            pl.BlockSpec((TM * N, E), lambda h, i: (i, 0)),     # edge feats (flat)
            pl.BlockSpec((TM, N), lambda h, i: (i, 0)),         # additive mask
            head3((Din, p)),   # W1'
            head3((1, p)),     # b1'
            head3((p, F)),     # Wa1_i
            head3((p, F)),     # Wa1_j
            head3((E, F)),     # Wa1_e
            head3((1, F)),     # ba1
            head3((1, F)),     # Wa2 (row vector)
            head3((1, 1)),     # ba2
            head3((1, p)),     # ln2 gamma
            head3((1, p)),     # ln2 beta
        ],
        out_specs=pl.BlockSpec((1, TM, p), lambda h, i: (h, i, 0)),
        compiler_params=pltpu.CompilerParams(
            dimension_semantics=("parallel", "parallel")),
    )(xn, xn, ef2, mask,
      W1p, b1p, Wa1_i, Wa1_j, Wa1_e,
      params["ba1"], params["Wa2"], params["ba2"],
      params["ln2_g"], params["ln2_b"])

    # concat heads along the feature axis (same order as torch.concat).
    # Output stays (H, N, p) inside the kernel (blocks equal the full trailing
    # dims -> no alignment hazard); the transpose of this tiny tensor is cheap.
    return jnp.transpose(out, (1, 0, 2)).reshape(N, H * p)


def edge_gat_forward(x, params, *, row_tile=None):
    node_features, node_adjacent, edge_features = x[1][0], x[1][2], x[1][3]
    gat_out = gat_layer_pallas(node_features, edge_features, node_adjacent,
                               params, row_tile=row_tile)
    x1 = list(x[1])
    x1[0] = x[1][0] + gat_out
    return [x[0], x1]


# ----------------------------------------------------------------------------
# pure-JAX reference (mirrors the PyTorch forward) for a correctness check
# ----------------------------------------------------------------------------
def gat_layer_ref(node_features, edge_features, node_adjacent, params):
    adj1 = normalize_adjacent_matrix(node_adjacent.astype(jnp.float32))
    H, Din, p = params["W1"].shape
    N = node_features.shape[0]
    outs = []
    for hd in range(H):
        x = node_features
        mu = x.mean(-1, keepdims=True)
        var = ((x - mu) ** 2).mean(-1, keepdims=True)
        xn = (x - mu) / jnp.sqrt(var + 1e-5) * params["ln1_g"][hd, 0] + params["ln1_b"][hd, 0]
        h = xn @ params["W1"][hd] + params["b1"][hd, 0]
        feat = jnp.concatenate([
            jnp.broadcast_to(h[:, None, :], (N, N, p)),
            jnp.broadcast_to(h[None, :, :], (N, N, p)),
            edge_features], axis=-1)
        z = feat @ params["Wa1"][hd] + params["ba1"][hd, 0]
        z = 0.5 * z * (1.0 + jax.lax.erf(z * _SQRT2_INV))
        s = jnp.sum(z * params["Wa2"][hd, 0], axis=-1) + params["ba2"][hd, 0, 0]
        s = jnp.where(s > 0, s, 0.2 * s)
        s = jnp.where(adj1 > 0, s, -1e12)
        s = jax.nn.softmax(s, axis=-1)
        o = s @ h
        mu2 = o.mean(-1, keepdims=True)
        var2 = ((o - mu2) ** 2).mean(-1, keepdims=True)
        on = (o - mu2) / jnp.sqrt(var2 + 1e-5) * params["ln2_g"][hd, 0] + params["ln2_b"][hd, 0]
        outs.append(on)
    return jnp.concatenate(outs, axis=-1)


# ----------------------------------------------------------------------------
# deterministic synthetic parameters
# ----------------------------------------------------------------------------
def init_params(key, ndim_node_in, ndim_node_out, ndim_edge, num_heads):
    assert ndim_node_out % num_heads == 0
    p = ndim_node_out // num_heads
    F = 2 * p + ndim_edge
    ks = jax.random.split(key, 6)

    def unif(k, shape, fan_in):
        bound = 1.0 / math.sqrt(fan_in)
        return jax.random.uniform(k, shape, jnp.float32, -bound, bound)

    return {
        "ln1_g": jnp.ones((num_heads, 1, ndim_node_in), jnp.float32),
        "ln1_b": jnp.zeros((num_heads, 1, ndim_node_in), jnp.float32),
        "W1":    unif(ks[0], (num_heads, ndim_node_in, p), ndim_node_in),
        "b1":    unif(ks[1], (num_heads, 1, p), ndim_node_in),
        "Wa1":   unif(ks[2], (num_heads, F, F), F),
        "ba1":   unif(ks[3], (num_heads, 1, F), F),
        "Wa2":   unif(ks[4], (num_heads, 1, F), F),
        "ba2":   unif(ks[5], (num_heads, 1, 1), F),
        "ln2_g": jnp.ones((num_heads, 1, p), jnp.float32),
        "ln2_b": jnp.zeros((num_heads, 1, p), jnp.float32),
    }


if __name__ == "__main__":
    N, NDIM_IN, NDIM_OUT, NDIM_EDGE, HEADS = 16, 32, 32, 8, 4
    key = jax.random.PRNGKey(0)
    k_nf, k_ef, k_adj, k_prm = jax.random.split(key, 4)

    node_features = jax.random.normal(k_nf, (N, NDIM_IN), jnp.float32)
    edge_features = jax.random.normal(k_ef, (N, N, NDIM_EDGE), jnp.float32)
    adj = (jax.random.uniform(k_adj, (N, N)) > 0.6).astype(jnp.float32)
    adj = jnp.maximum(adj, adj.T)  # symmetric 0/1 adjacency

    params = init_params(k_prm, NDIM_IN, NDIM_OUT, NDIM_EDGE, HEADS)

    # x mirrors the nested structure used by the PyTorch module:
    #   x[1][0]=node_features, x[1][2]=node_adjacent, x[1][3]=edge_features
    x = [jnp.zeros((1,), jnp.float32),
         [node_features, jnp.zeros((1,), jnp.float32), adj, edge_features]]

    # row_tile=8 exercises the (head, row-tile) grid (2 row tiles per head)
    x_out = edge_gat_forward(x, params, row_tile=8)
    new_nodes = jax.block_until_ready(x_out[1][0])

    ref = node_features + gat_layer_ref(node_features, edge_features, adj, params)
    err = float(jnp.max(jnp.abs(new_nodes - ref)))
    assert new_nodes.shape == (N, NDIM_OUT)
    assert err < 1e-3, f"max abs error vs reference: {err}"
    print("KERNEL_OK")
</pallas_src>

<mosaic_0001>
module attributes {stable_mosaic.version = 11 : i64} {
  func.func @_gat_head_kernel(%arg0: i32, %arg1: i32, %arg2: memref<8x32xf32, #tpu.memory_space<vmem>>, %arg3: memref<16x32xf32, #tpu.memory_space<vmem>>, %arg4: memref<128x8xf32, #tpu.memory_space<vmem>>, %arg5: memref<8x16xf32, #tpu.memory_space<vmem>>, %arg6: memref<1x32x8xf32, #tpu.memory_space<vmem>>, %arg7: memref<1x1x8xf32, #tpu.memory_space<vmem>>, %arg8: memref<1x8x24xf32, #tpu.memory_space<vmem>>, %arg9: memref<1x8x24xf32, #tpu.memory_space<vmem>>, %arg10: memref<1x8x24xf32, #tpu.memory_space<vmem>>, %arg11: memref<1x1x24xf32, #tpu.memory_space<vmem>>, %arg12: memref<1x1x24xf32, #tpu.memory_space<vmem>>, %arg13: memref<1x1x1xf32, #tpu.memory_space<vmem>>, %arg14: memref<1x1x8xf32, #tpu.memory_space<vmem>>, %arg15: memref<1x1x8xf32, #tpu.memory_space<vmem>>, %arg16: memref<1x8x8xf32, #tpu.memory_space<vmem>>) attributes {dimension_semantics = [#tpu.dimension_semantics<parallel>, #tpu.dimension_semantics<parallel>], iteration_bounds = array<i64: 4, 2>, scalar_prefetch = 0 : i64, scratch_operands = 0 : i64, tpu.core_type = #tpu.core_type<tc>, window_params = [{transform_indices = @transform_0, window_bounds = array<i64: 8, 32>}, {pipeline_mode = #tpu.pipeline_mode<synchronous>, transform_indices = @transform_1, window_bounds = array<i64: 16, 32>}, {transform_indices = @transform_2, window_bounds = array<i64: 128, 8>}, {transform_indices = @transform_3, window_bounds = array<i64: 8, 16>}, {transform_indices = @transform_4, window_bounds = array<i64: 1, 32, 8>}, {transform_indices = @transform_5, window_bounds = array<i64: 1, 1, 8>}, {transform_indices = @transform_6, window_bounds = array<i64: 1, 8, 24>}, {transform_indices = @transform_7, window_bounds = array<i64: 1, 8, 24>}, {transform_indices = @transform_8, window_bounds = array<i64: 1, 8, 24>}, {transform_indices = @transform_9, window_bounds = array<i64: 1, 1, 24>}, {transform_indices = @transform_10, window_bounds = array<i64: 1, 1, 24>}, {transform_indices = @transform_11, window_bounds = array<i64: 1, 1, 1>}, {transform_indices = @transform_12, window_bounds = array<i64: 1, 1, 8>}, {transform_indices = @transform_13, window_bounds = array<i64: 1, 1, 8>}, {transform_indices = @transform_14, window_bounds = array<i64: 1, 8, 8>}]} {
    %c0 = arith.constant 0 : index
    %c0_0 = arith.constant 0 : index
    %c0_1 = arith.constant 0 : index
    %0 = vector.load %arg6[%c0, %c0_0, %c0_1] : memref<1x32x8xf32, #tpu.memory_space<vmem>>, vector<1x32x8xf32>
    %1 = vector.shape_cast %0 : vector<1x32x8xf32> to vector<32x8xf32>
    %c0_2 = arith.constant 0 : index
    %c0_3 = arith.constant 0 : index
    %c0_4 = arith.constant 0 : index
    %2 = vector.load %arg7[%c0_2, %c0_3, %c0_4] : memref<1x1x8xf32, #tpu.memory_space<vmem>>, vector<1x1x8xf32>
    %3 = vector.shape_cast %2 : vector<1x1x8xf32> to vector<1x8xf32>
    %c0_5 = arith.constant 0 : index
    %c0_6 = arith.constant 0 : index
    %4 = vector.load %arg2[%c0_5, %c0_6] : memref<8x32xf32, #tpu.memory_space<vmem>>, vector<8x32xf32>
    %cst = arith.constant dense<0.000000e+00> : vector<8x8xf32>
    %5 = tpu.matmul %4, %1, %cst {dimension_numbers = #tpu.dot_dimension_numbers<[1], [0], [0], [1], [0, 0, 1, 1], [], []>} : vector<8x32xf32>, vector<32x8xf32>, vector<8x8xf32> -> vector<8x8xf32>
    %6 = vector.broadcast %3 : vector<1x8xf32> to vector<8x8xf32>
    %7 = arith.addf %5, %6 : vector<8x8xf32>
    %c0_7 = arith.constant 0 : index
    %c0_8 = arith.constant 0 : index
    %8 = vector.load %arg3[%c0_7, %c0_8] : memref<16x32xf32, #tpu.memory_space<vmem>>, vector<16x32xf32>
    %cst_9 = arith.constant dense<0.000000e+00> : vector<16x8xf32>
    %9 = tpu.matmul %8, %1, %cst_9 {dimension_numbers = #tpu.dot_dimension_numbers<[1], [0], [0], [1], [0, 0, 1, 1], [], []>} : vector<16x32xf32>, vector<32x8xf32>, vector<16x8xf32> -> vector<16x8xf32>
    %10 = vector.broadcast %3 : vector<1x8xf32> to vector<16x8xf32>
    %11 = arith.addf %9, %10 : vector<16x8xf32>
    %c0_10 = arith.constant 0 : index
    %c0_11 = arith.constant 0 : index
    %c0_12 = arith.constant 0 : index
    %12 = vector.load %arg8[%c0_10, %c0_11, %c0_12] : memref<1x8x24xf32, #tpu.memory_space<vmem>>, vector<1x8x24xf32>
    %13 = vector.shape_cast %12 : vector<1x8x24xf32> to vector<8x24xf32>
    %cst_13 = arith.constant dense<0.000000e+00> : vector<8x24xf32>
    %14 = tpu.matmul %7, %13, %cst_13 {dimension_numbers = #tpu.dot_dimension_numbers<[1], [0], [0], [1], [0, 0, 1, 1], [], []>} : vector<8x8xf32>, vector<8x24xf32>, vector<8x24xf32> -> vector<8x24xf32>
    %c0_14 = arith.constant 0 : index
    %c0_15 = arith.constant 0 : index
    %c0_16 = arith.constant 0 : index
    %15 = vector.load %arg9[%c0_14, %c0_15, %c0_16] : memref<1x8x24xf32, #tpu.memory_space<vmem>>, vector<1x8x24xf32>
    %16 = vector.shape_cast %15 : vector<1x8x24xf32> to vector<8x24xf32>
    %cst_17 = arith.constant dense<0.000000e+00> : vector<16x24xf32>
    %17 = tpu.matmul %11, %16, %cst_17 {dimension_numbers = #tpu.dot_dimension_numbers<[1], [0], [0], [1], [0, 0, 1, 1], [], []>} : vector<16x8xf32>, vector<8x24xf32>, vector<16x24xf32> -> vector<16x24xf32>
    %c0_18 = arith.constant 0 : index
    %c0_19 = arith.constant 0 : index
    %18 = vector.load %arg4[%c0_18, %c0_19] : memref<128x8xf32, #tpu.memory_space<vmem>>, vector<128x8xf32>
    %c0_20 = arith.constant 0 : index
    %c0_21 = arith.constant 0 : index
    %c0_22 = arith.constant 0 : index
    %19 = vector.load %arg10[%c0_20, %c0_21, %c0_22] : memref<1x8x24xf32, #tpu.memory_space<vmem>>, vector<1x8x24xf32>
    %20 = vector.shape_cast %19 : vector<1x8x24xf32> to vector<8x24xf32>
    %cst_23 = arith.constant dense<0.000000e+00> : vector<128x24xf32>
    %21 = tpu.matmul %18, %20, %cst_23 {dimension_numbers = #tpu.dot_dimension_numbers<[1], [0], [0], [1], [0, 0, 1, 1], [], []>} : vector<128x8xf32>, vector<8x24xf32>, vector<128x24xf32> -> vector<128x24xf32>
    %22 = vector.shape_cast %21 : vector<128x24xf32> to vector<8x16x24xf32>
    %23 = vector.shape_cast %14 : vector<8x24xf32> to vector<8x1x24xf32>
    %24 = vector.shape_cast %17 : vector<16x24xf32> to vector<1x16x24xf32>
    %25 = vector.broadcast %23 : vector<8x1x24xf32> to vector<8x16x24xf32>
    %26 = vector.broadcast %24 : vector<1x16x24xf32> to vector<8x16x24xf32>
    %27 = arith.addf %25, %26 : vector<8x16x24xf32>
    %28 = arith.addf %27, %22 : vector<8x16x24xf32>
    %c0_24 = arith.constant 0 : index
    %c0_25 = arith.constant 0 : index
    %c0_26 = arith.constant 0 : index
    %29 = vector.load %arg11[%c0_24, %c0_25, %c0_26] : memref<1x1x24xf32, #tpu.memory_space<vmem>>, vector<1x1x24xf32>
    %30 = vector.shape_cast %29 : vector<1x1x24xf32> to vector<1x24xf32>
    %31 = vector.shape_cast %30 : vector<1x24xf32> to vector<1x1x24xf32>
    %32 = vector.broadcast %31 : vector<1x1x24xf32> to vector<8x16x24xf32>
    %33 = arith.addf %28, %32 : vector<8x16x24xf32>
    %cst_27 = arith.constant 0.707106769 : f32
    %34 = vector.broadcast %cst_27 : f32 to vector<8x16x24xf32>
    %35 = arith.mulf %33, %34 : vector<8x16x24xf32>
    %cst_28 = arith.constant 0.000000e+00 : f32
    %36 = vector.broadcast %cst_28 : f32 to vector<8x16x24xf32>
    %37 = arith.cmpf olt, %35, %36 : vector<8x16x24xf32>
    %cst_29 = arith.constant -1.000000e+00 : f32
    %cst_30 = arith.constant 1.000000e+00 : f32
    %38 = vector.broadcast %cst_29 : f32 to vector<8x16x24xf32>
    %39 = vector.broadcast %cst_30 : f32 to vector<8x16x24xf32>
    %40 = arith.select %37, %38, %39 : vector<8x16x24xi1>, vector<8x16x24xf32>
    %41 = math.absf %35 : vector<8x16x24xf32>
    %cst_31 = arith.constant 0.327591091 : f32
    %42 = vector.broadcast %cst_31 : f32 to vector<8x16x24xf32>
    %43 = arith.mulf %42, %41 : vector<8x16x24xf32>
    %cst_32 = arith.constant 1.000000e+00 : f32
    %44 = vector.broadcast %cst_32 : f32 to vector<8x16x24xf32>
    %45 = arith.addf %44, %43 : vector<8x16x24xf32>
    %46 = tpu.reciprocal %45 {approx = true} : vector<8x16x24xf32> -> vector<8x16x24xf32>
    %47 = arith.mulf %45, %46 : vector<8x16x24xf32>
    %cst_33 = arith.constant 2.000000e+00 : f32
    %48 = vector.broadcast %cst_33 : f32 to vector<8x16x24xf32>
    %49 = arith.subf %48, %47 : vector<8x16x24xf32>
    %50 = arith.mulf %46, %49 : vector<8x16x24xf32>
    %cst_34 = arith.constant 1.06140542 : f32
    %51 = vector.broadcast %cst_34 : f32 to vector<8x16x24xf32>
    %52 = arith.mulf %51, %50 : vector<8x16x24xf32>
    %cst_35 = arith.constant -1.45315206 : f32
    %53 = vector.broadcast %cst_35 : f32 to vector<8x16x24xf32>
    %54 = arith.addf %52, %53 : vector<8x16x24xf32>
    %55 = arith.mulf %54, %50 : vector<8x16x24xf32>
    %cst_36 = arith.constant 1.42141378 : f32
    %56 = vector.broadcast %cst_36 : f32 to vector<8x16x24xf32>
    %57 = arith.addf %55, %56 : vector<8x16x24xf32>
    %58 = arith.mulf %57, %50 : vector<8x16x24xf32>
    %cst_37 = arith.constant -0.284496725 : f32
    %59 = vector.broadcast %cst_37 : f32 to vector<8x16x24xf32>
    %60 = arith.addf %58, %59 : vector<8x16x24xf32>
    %61 = arith.mulf %60, %50 : vector<8x16x24xf32>
    %cst_38 = arith.constant 0.254829586 : f32
    %62 = vector.broadcast %cst_38 : f32 to vector<8x16x24xf32>
    %63 = arith.addf %61, %62 : vector<8x16x24xf32>
    %64 = arith.mulf %63, %50 : vector<8x16x24xf32>
    %cst_39 = arith.constant 0.000000e+00 : f32
    %65 = vector.broadcast %cst_39 : f32 to vector<8x16x24xf32>
    %66 = arith.subf %65, %41 : vector<8x16x24xf32>
    %67 = arith.mulf %66, %41 : vector<8x16x24xf32>
    %68 = math.exp %67 : vector<8x16x24xf32>
    %69 = arith.mulf %64, %68 : vector<8x16x24xf32>
    %cst_40 = arith.constant 1.000000e+00 : f32
    %70 = vector.broadcast %cst_40 : f32 to vector<8x16x24xf32>
    %71 = arith.subf %70, %69 : vector<8x16x24xf32>
    %72 = arith.mulf %40, %71 : vector<8x16x24xf32>
    %cst_41 = arith.constant 5.000000e-01 : f32
    %73 = vector.broadcast %cst_41 : f32 to vector<8x16x24xf32>
    %74 = arith.mulf %73, %33 : vector<8x16x24xf32>
    %cst_42 = arith.constant 1.000000e+00 : f32
    %75 = vector.broadcast %cst_42 : f32 to vector<8x16x24xf32>
    %76 = arith.addf %75, %72 : vector<8x16x24xf32>
    %77 = arith.mulf %74, %76 : vector<8x16x24xf32>
    %c0_43 = arith.constant 0 : index
    %c0_44 = arith.constant 0 : index
    %c0_45 = arith.constant 0 : index
    %78 = vector.load %arg12[%c0_43, %c0_44, %c0_45] : memref<1x1x24xf32, #tpu.memory_space<vmem>>, vector<1x1x24xf32>
    %79 = vector.shape_cast %78 : vector<1x1x24xf32> to vector<1x24xf32>
    %80 = vector.shape_cast %79 : vector<1x24xf32> to vector<1x1x24xf32>
    %81 = vector.broadcast %80 : vector<1x1x24xf32> to vector<8x16x24xf32>
    %82 = arith.mulf %77, %81 : vector<8x16x24xf32>
    %cst_46 = arith.constant dense<0.000000e+00> : vector<8x16xf32>
    %83 = vector.multi_reduction <add>, %82, %cst_46 [2] : vector<8x16x24xf32> to vector<8x16xf32>
    %c0_47 = arith.constant 0 : index
    %c0_48 = arith.constant 0 : index
    %c0_49 = arith.constant 0 : index
    %84 = vector.load %arg13[%c0_47, %c0_48, %c0_49] : memref<1x1x1xf32, #tpu.memory_space<vmem>>, vector<1x1x1xf32>
    %85 = vector.shape_cast %84 : vector<1x1x1xf32> to vector<1x1xf32>
    %86 = vector.broadcast %85 : vector<1x1xf32> to vector<8x16xf32>
    %87 = arith.addf %83, %86 : vector<8x16xf32>
    %cst_50 = arith.constant 0.000000e+00 : f32
    %88 = vector.broadcast %cst_50 : f32 to vector<8x16xf32>
    %89 = arith.cmpf ogt, %87, %88 : vector<8x16xf32>
    %cst_51 = arith.constant 2.000000e-01 : f32
    %90 = vector.broadcast %cst_51 : f32 to vector<8x16xf32>
    %91 = arith.mulf %90, %87 : vector<8x16xf32>
    %92 = arith.select %89, %87, %91 : vector<8x16xi1>, vector<8x16xf32>
    %c0_52 = arith.constant 0 : index
    %c0_53 = arith.constant 0 : index
    %93 = vector.load %arg5[%c0_52, %c0_53] : memref<8x16xf32, #tpu.memory_space<vmem>>, vector<8x16xf32>
    %94 = arith.addf %92, %93 : vector<8x16xf32>
    %cst_54 = arith.constant dense<0xFF800000> : vector<8xf32>
    %95 = vector.multi_reduction <maximumf>, %94, %cst_54 [1] : vector<8x16xf32> to vector<8xf32>
    %96 = vector.shape_cast %95 : vector<8xf32> to vector<8x1xf32>
    %97 = vector.broadcast %96 : vector<8x1xf32> to vector<8x16xf32>
    %98 = arith.subf %94, %97 : vector<8x16xf32>
    %99 = math.exp %98 : vector<8x16xf32>
    %cst_55 = arith.constant dense<0.000000e+00> : vector<8xf32>
    %100 = vector.multi_reduction <add>, %99, %cst_55 [1] : vector<8x16xf32> to vector<8xf32>
    %101 = vector.shape_cast %100 : vector<8xf32> to vector<8x1xf32>
    %cst_56 = arith.constant 1.000000e+00 : f32
    %102 = vector.broadcast %cst_56 : f32 to vector<8x1xf32>
    %103 = arith.divf %102, %101 : vector<8x1xf32>
    %104 = vector.broadcast %103 : vector<8x1xf32> to vector<8x16xf32>
    %105 = arith.mulf %99, %104 : vector<8x16xf32>
    %cst_57 = arith.constant dense<0.000000e+00> : vector<8x8xf32>
    %106 = tpu.matmul %105, %11, %cst_57 {dimension_numbers = #tpu.dot_dimension_numbers<[1], [0], [0], [1], [0, 0, 1, 1], [], []>} : vector<8x16xf32>, vector<16x8xf32>, vector<8x8xf32> -> vector<8x8xf32>
    %cst_58 = arith.constant dense<0.000000e+00> : vector<8xf32>
    %107 = vector.multi_reduction <add>, %106, %cst_58 [1] : vector<8x8xf32> to vector<8xf32>
    %108 = vector.shape_cast %107 : vector<8xf32> to vector<8x1xf32>
    %cst_59 = arith.constant 8.000000e+00 : f32
    %109 = vector.broadcast %cst_59 : f32 to vector<8x1xf32>
    %110 = arith.divf %108, %109 : vector<8x1xf32>
    %111 = vector.broadcast %110 : vector<8x1xf32> to vector<8x8xf32>
    %112 = arith.subf %106, %111 : vector<8x8xf32>
    %113 = arith.mulf %112, %112 : vector<8x8xf32>
    %cst_60 = arith.constant dense<0.000000e+00> : vector<8xf32>
    %114 = vector.multi_reduction <add>, %113, %cst_60 [1] : vector<8x8xf32> to vector<8xf32>
    %115 = vector.shape_cast %114 : vector<8xf32> to vector<8x1xf32>
    %cst_61 = arith.constant 8.000000e+00 : f32
    %116 = vector.broadcast %cst_61 : f32 to vector<8x1xf32>
    %117 = arith.divf %115, %116 : vector<8x1xf32>
    %118 = vector.broadcast %110 : vector<8x1xf32> to vector<8x8xf32>
    %119 = arith.subf %106, %118 : vector<8x8xf32>
    %cst_62 = arith.constant 9.99999974E-6 : f32
    %120 = vector.broadcast %cst_62 : f32 to vector<8x1xf32>
    %121 = arith.addf %117, %120 : vector<8x1xf32>
    %122 = math.rsqrt %121 : vector<8x1xf32>
    %123 = vector.broadcast %122 : vector<8x1xf32> to vector<8x8xf32>
    %124 = arith.mulf %119, %123 : vector<8x8xf32>
    %c0_63 = arith.constant 0 : index
    %c0_64 = arith.constant 0 : index
    %c0_65 = arith.constant 0 : index
    %125 = vector.load %arg14[%c0_63, %c0_64, %c0_65] : memref<1x1x8xf32, #tpu.memory_space<vmem>>, vector<1x1x8xf32>
    %126 = vector.shape_cast %125 : vector<1x1x8xf32> to vector<1x8xf32>
    %127 = vector.broadcast %126 : vector<1x8xf32> to vector<8x8xf32>
    %128 = arith.mulf %124, %127 : vector<8x8xf32>
    %c0_66 = arith.constant 0 : index
    %c0_67 = arith.constant 0 : index
    %c0_68 = arith.constant 0 : index
    %129 = vector.load %arg15[%c0_66, %c0_67, %c0_68] : memref<1x1x8xf32, #tpu.memory_space<vmem>>, vector<1x1x8xf32>
    %130 = vector.shape_cast %129 : vector<1x1x8xf32> to vector<1x8xf32>
    %131 = vector.broadcast %130 : vector<1x8xf32> to vector<8x8xf32>
    %132 = arith.addf %128, %131 : vector<8x8xf32>
    %133 = vector.shape_cast %132 : vector<8x8xf32> to vector<1x8x8xf32>
    %c0_69 = arith.constant 0 : index
    %c0_70 = arith.constant 0 : index
    %c0_71 = arith.constant 0 : index
    %134 = vector.load %arg16[%c0_69, %c0_70, %c0_71] : memref<1x8x8xf32, #tpu.memory_space<vmem>>, vector<1x8x8xf32>
    tpu.vector_store %arg16[%c0_69, %c0_70, %c0_71], %133 {strides = array<i32>} : memref<1x8x8xf32, #tpu.memory_space<vmem>>, vector<1x8x8xf32>,
    return
  }
  func.func @transform_0(%arg0: i32, %arg1: i32) -> (i32, i32) {
    %c0_i32 = arith.constant 0 : i32
    %c0_i32_0 = arith.constant 0 : i32
    return %arg1, %c0_i32 : i32, i32
  }
  func.func @transform_1(%arg0: i32, %arg1: i32) -> (i32, i32) {
    %c0_i32 = arith.constant 0 : i32
    %c0_i32_0 = arith.constant 0 : i32
    %c0_i32_1 = arith.constant 0 : i32
    return %c0_i32, %c0_i32_0 : i32, i32
  }
  func.func @transform_2(%arg0: i32, %arg1: i32) -> (i32, i32) {
    %c0_i32 = arith.constant 0 : i32
    %c0_i32_0 = arith.constant 0 : i32
    return %arg1, %c0_i32 : i32, i32
  }
  func.func @transform_3(%arg0: i32, %arg1: i32) -> (i32, i32) {
    %c0_i32 = arith.constant 0 : i32
    %c0_i32_0 = arith.constant 0 : i32
    return %arg1, %c0_i32 : i32, i32
  }
  func.func @transform_4(%arg0: i32, %arg1: i32) -> (i32, i32, i32) {
    %c0_i32 = arith.constant 0 : i32
    %c0_i32_0 = arith.constant 0 : i32
    %c0_i32_1 = arith.constant 0 : i32
    return %arg0, %c0_i32, %c0_i32_0 : i32, i32, i32
  }
  func.func @transform_5(%arg0: i32, %arg1: i32) -> (i32, i32, i32) {
    %c0_i32 = arith.constant 0 : i32
    %c0_i32_0 = arith.constant 0 : i32
    %c0_i32_1 = arith.constant 0 : i32
    return %arg0, %c0_i32, %c0_i32_0 : i32, i32, i32
  }
  func.func @transform_6(%arg0: i32, %arg1: i32) -> (i32, i32, i32) {
    %c0_i32 = arith.constant 0 : i32
    %c0_i32_0 = arith.constant 0 : i32
    %c0_i32_1 = arith.constant 0 : i32
    return %arg0, %c0_i32, %c0_i32_0 : i32, i32, i32
  }
  func.func @transform_7(%arg0: i32, %arg1: i32) -> (i32, i32, i32) {
    %c0_i32 = arith.constant 0 : i32
    %c0_i32_0 = arith.constant 0 : i32
    %c0_i32_1 = arith.constant 0 : i32
    return %arg0, %c0_i32, %c0_i32_0 : i32, i32, i32
  }
  func.func @transform_8(%arg0: i32, %arg1: i32) -> (i32, i32, i32) {
    %c0_i32 = arith.constant 0 : i32
    %c0_i32_0 = arith.constant 0 : i32
    %c0_i32_1 = arith.constant 0 : i32
    return %arg0, %c0_i32, %c0_i32_0 : i32, i32, i32
  }
  func.func @transform_9(%arg0: i32, %arg1: i32) -> (i32, i32, i32) {
    %c0_i32 = arith.constant 0 : i32
    %c0_i32_0 = arith.constant 0 : i32
    %c0_i32_1 = arith.constant 0 : i32
    return %arg0, %c0_i32, %c0_i32_0 : i32, i32, i32
  }
  func.func @transform_10(%arg0: i32, %arg1: i32) -> (i32, i32, i32) {
    %c0_i32 = arith.constant 0 : i32
    %c0_i32_0 = arith.constant 0 : i32
    %c0_i32_1 = arith.constant 0 : i32
    return %arg0, %c0_i32, %c0_i32_0 : i32, i32, i32
  }
  func.func @transform_11(%arg0: i32, %arg1: i32) -> (i32, i32, i32) {
    %c0_i32 = arith.constant 0 : i32
    %c0_i32_0 = arith.constant 0 : i32
    %c0_i32_1 = arith.constant 0 : i32
    return %arg0, %c0_i32, %c0_i32_0 : i32, i32, i32
  }
  func.func @transform_12(%arg0: i32, %arg1: i32) -> (i32, i32, i32) {
    %c0_i32 = arith.constant 0 : i32
    %c0_i32_0 = arith.constant 0 : i32
    %c0_i32_1 = arith.constant 0 : i32
    return %arg0, %c0_i32, %c0_i32_0 : i32, i32, i32
  }
  func.func @transform_13(%arg0: i32, %arg1: i32) -> (i32, i32, i32) {
    %c0_i32 = arith.constant 0 : i32
    %c0_i32_0 = arith.constant 0 : i32
    %c0_i32_1 = arith.constant 0 : i32
    return %arg0, %c0_i32, %c0_i32_0 : i32, i32, i32
  }
  func.func @transform_14(%arg0: i32, %arg1: i32) -> (i32, i32, i32) {
    %c0_i32 = arith.constant 0 : i32
    %c0_i32_0 = arith.constant 0 : i32
    return %arg0, %arg1, %c0_i32 : i32, i32, i32
  }
}

</mosaic_0001>

<bundles_post_ra>
// kernel: tpu_custom_call.1
= control target key start
LH: loop header
LB: loop body
LE: loop exit
PB: predicated region body
PF: predicated region fallthrough
CT: control target
= control target key end

     0   :  { %s3436_s29 = smov 0   ;;  %s3438_s30 = smov 0   ;;  %s4427_s0 = inlined_call_operand.vmem [shape: f32[16,32], index: 0, kind: input, shape index: {}]   ;;  %s4428_s1 = inlined_call_operand.vmem [shape: f32[16,32], index: 1, kind: input, shape index: {}]   ;;  %s4429_s2 = inlined_call_operand.vmem [shape: f32[256,8], index: 2, kind: input, shape index: {}]   ;;  %s4430_s3 = inlined_call_operand.vmem [shape: f32[16,16], index: 3, kind: input, shape index: {}]   ;;  %s4431_s4 = inlined_call_operand.vmem [shape: f32[4,32,8], index: 4, kind: input, shape index: {}]   ;;  %s4432_s5 = inlined_call_operand.vmem [shape: f32[4,1,8], index: 5, kind: input, shape index: {}]   ;;  %s4433_s6 = inlined_call_operand.vmem [shape: f32[4,8,24], index: 6, kind: input, shape index: {}]   ;;  %s4434_s7 = inlined_call_operand.vmem [shape: f32[4,8,24], index: 7, kind: input, shape index: {}]   ;;  %s4435_s8 = inlined_call_operand.vmem [shape: f32[4,8,24], index: 8, kind: input, shape index: {}]   ;;  %s4436_s9 = inlined_call_operand.vmem [shape: f32[4,1,24], index: 9, kind: input, shape index: {}]   ;;  %s4437_s10 = inlined_call_operand.vmem [shape: f32[4,1,24], index: 10, kind: input, shape index: {}]   ;;  %s4438_s11 = inlined_call_operand.vmem [shape: f32[4,1,1], index: 11, kind: input, shape index: {}]   ;;  %s4439_s12 = inlined_call_operand.vmem [shape: f32[4,1,8], index: 12, kind: input, shape index: {}]   ;;  %s4440_s13 = inlined_call_operand.vmem [shape: f32[4,1,8], index: 13, kind: input, shape index: {}]   ;;  %s4441_s14 = inlined_call_operand.vmem [shape: f32[4,16,8], index: 14, kind: output, shape index: {}]  }
   0x1   :  { %4470 = sst [smem:[#allocation32_spill]] %s4427_s0  ;;  %s3440_s15 = smov 0  }
   0x2   :  { %4471 = sst [smem:[#allocation33_spill]] %s4431_s4  ;;  %s3442_s16 = smov 0  }
   0x3   :  { %s3444_s17 = smov 0  }
   0x4 LB: > { %s33_s18 = sadd.s32 1, %s3345_s15  ;;  %s36_s19 = sadd.s32 1, %s3349_s16  ;;  %s3353_s17 = sphi %s3444_s17, %s24_s17   ;;  %s3349_s16 = sphi %s3442_s16, %s4541_s16   ;;  %s3345_s15 = sphi %s3440_s15, %s4540_s15   ;;  %s3341_s30 = sphi %s3438_s30, %s4539_s30   ;;  %s3337_s29 = sphi %s3436_s29, %s4538_s29  }
   0x5   : > { %p34_p0 = scmp.ge.s32.totalorder %s33_s18, 2  ;;  %p3002_p1 = scmp.ge.s32.totalorder %s3353_s17, 1 }
   0x6   : > { %p530_p2 = scmp.lt.s32.totalorder %s3353_s17, 9 }
   0x7   : > { %s4543_s18 = smov (%p34_p0, %s33_s18), 0  ;;  %s4545_s19 = smov (!%p34_p0, %s36_s19), %s3349_s16 }
   0x8   : > { %p531_p3 = pnand %p3002_p1, %p530_p2  ;;  %p38_p4 = scmp.ge.s32.totalorder %s4545_s19, 4 }
   0xa   : > { %s4547_s19 = smov (%p38_p4, %s4545_s19), 0  ;;  %534 = sbr.rel (%p531_p3) target bundleno = 2116 (0x844), region = 76 }
   0xb   : > { %4472 = sst [smem:[#allocation2_spill]] %s4547_s19 }
  0x11   : > { %p636_p5 = scmp.lt.s32.totalorder %s3341_s30, 3  ;;  %p622_p6 = scmp.lt.s32.totalorder %s3337_s29, 1  ;;  %vm691_vm0 = vcmask 261120   ;;  %v3355_v0 = vmov 0.0|0.0   ;;  %vm3356_vm1 = vmmov 0   ;;  %v3357_v1 = vmov 0.0  }
  0x12   : > { %3147 = vmatprep.subr.bf16.mxu0 %v3355_v0  ;;  %3090 = vmatprep.mubr.msk.f32.mxu0 %vm3356_vm1, %v3357_v1  ;;  %v765_v2 = vld [vmem:[%s4428_s1] sm:$0xff]  ;;  %s4473_s4 = sld [smem:[#allocation33_spill]]  ;;  %s4474_s0 = sld [smem:[#allocation32_spill]]  ;;  %v766_v10 = vld [vmem:[%s4428_s1 + $0x8] sm:$0xff]  ;;  %v4442_v14 = vlaneseq  ;;  %vm849_vm2 = vcmask 64512   ;;  %v3358_v48 = vmov 0  }
  0x13   : > { %s4549_s30 = smov (!%p636_p5, %s3341_s30), 3  ;;  %3101 = vmatprep.mubr.msk.f32.mxu1 %vm691_vm0, %v765_v2  ;;  %3212 = vset.pattern.permute.xlu0 %v3358_v48  ;;  %v3359_v58 = vmov 1966171168   ;;  %vm1847_vm15 = vcmask 195584  }
  0x14   : > { %s3479_s22 = scalar_select %p622_p6, %s3337_s29, 1  ;;  %v3514_v15 = vshrl.u32 %v4442_v14, 7  ;;  %3213 = vset.pattern.permute.xlu1 %v3358_v48  ;;  %v1218_v59 = vunpack.c.l.s4 %v3359_v58 }
  0x15   : > { %s3045_s23 = sshll.u32 %s4549_s30, 5  ;;  %s3009_s28 = sshll.u32 %s4549_s30, 3 }
  0x16   : > { %s3003_s27 = sshll.u32 %s3479_s22, 3  ;;  %s647_s25 = scalar_lea.vmem %s4433_s6, %s3009_s28  ;;  %4475 = vst [vmem:[#allocation3_spill] sm:$0xff] %v3514_v15  ;;  %v3520_v17 = vsub.s32 0, %v3514_v15  ;;  %v3573_v44 = vsub.s32 1, %v3514_v15  ;;  %v3578_v46 = vsub.s32 2, %v3514_v15  ;;  %v3587_v50 = vsub.s32 3, %v3514_v15 }
  0x17   : > { %v848_v11 = vld [vmem:[%s647_s25] sm:$0xff]  ;;  %s643_s21 = scalar_lea.vmem %s4432_s5, %s4549_s30  ;;  %v3592_v52 = vsub.s32 4, %v3514_v15  ;;  %v3597_v54 = vsub.s32 5, %v3514_v15  ;;  %v3602_v56 = vsub.s32 6, %v3514_v15  ;;  %v1219_v60 = vunpack.c.0.s8 %v1218_v59  ;;  %s658_s20 = scalar_lea.vmem %s4436_s9, %s4549_s30 }
  0x18   : > { %s640_s26 = scalar_lea.vmem %s4473_s4, %s3045_s23  ;;  %s625_s19 = scalar_lea.vmem %s4474_s0, %s3003_s27  ;;  %4476 = vst [vmem:[#allocation4_spill] sm:$0xff] %v3520_v17  ;;  %v3014_v19 = vld [vmem:[%s643_s21] ss:$0 sm:$0xff]  ;;  %4477 = vst [vmem:[#allocation5_spill] sm:$0xff] %v3573_v44 }
  0x19   : > { %v679_v3 = vld [vmem:[%s640_s26] sm:$0xff]  ;;  %v680_v4 = vld [vmem:[%s640_s26 + $0x8] sm:$0xff]  ;;  %v681_v5 = vld [vmem:[%s640_s26 + $0x10] sm:$0xff]  ;;  %s655_s4 = scalar_lea.vmem %s4435_s8, %s3009_s28  ;;  %s3511_s0 = scalar_lea.vmem %s4430_s3, %s3003_s27  ;;  %4478 = vst [vmem:[#allocation6_spill] sm:$0xff] %v3578_v46  ;;  %v1222_v61 = vsub.s32 %v1219_v60, %v3514_v15 }
  0x1a   : > { %v3148_v6 = vpack.c.bf16 %v680_v4, %v679_v3  ;;  %v682_v7 = vld [vmem:[%s640_s26 + $0x18] sm:$0xff]  ;;  %v684_v9 = vld [vmem:[%s625_s19] sm:$0xff]  ;;  %s651_s19 = scalar_lea.vmem %s4434_s7, %s3009_s28  ;;  %s3004_s28 = sshll.u32 %s3337_s29, 4  ;;  %4479 = vst [vmem:[#allocation7_spill] sm:$0xff] %v3587_v50  ;;  %4480 = vst [vmem:[#allocation8_spill] sm:$0xff] %v3592_v52 }
  0x1b   : > { %v3151_v8 = vpack.c.bf16 %v682_v7, %v681_v5  ;;  %v923_v12 = vld [vmem:[%s651_s19] sm:$0xff]  ;;  %p627_p7 = scmp.lt.s32.totalorder %s3004_s28, 31  ;;  %s664_s26 = scalar_lea.vmem %s4438_s11, %s4549_s30  ;;  %4481 = vst [vmem:[#allocation9_spill] sm:$0xff] %v3597_v54  ;;  %4482 = vst [vmem:[#allocation10_spill] sm:$0xff] %v3602_v56 }
  0x1c   : > { %3149 = vmatpush3.bf16.msra.mxu0 %v3148_v6  ;;  %3154 = vmatprep.subr.bf16.mxu1 %v3148_v6  ;;  %v1021_v13 = vld [vmem:[%s655_s4] sm:$0xff]  ;;  %s661_s24 = scalar_lea.vmem %s4437_s10, %s4549_s30  ;;  %s667_s29 = scalar_lea.vmem %s4439_s12, %s4549_s30 }
  0x1d   : > { %3156 = vmatpush3.bf16.msra.mxu1 %v3148_v6  ;;  %3150 = vmatprep.subr.bf16.mxu0 %v3355_v0  ;;  %v3517_v16 = vld [vmem:[%s3511_s0] sm:$0xff]  ;;  %s4551_s28 = smov (!%p627_p7, %s3004_s28), 31  ;;  %s670_s27 = scalar_lea.vmem %s4440_s13, %s4549_s30 }
  0x1e   : > { %3158 = vmatprep.subr.bf16.mxu1 %v3151_v8  ;;  %v1975_v18 = vrot.slane %v3517_v16, %v3520_v17  ;;  %s3005_s19 = sshll.u32 %s4551_s28, 3  ;;  %v1986_v45 = vrot.slane %v3517_v16, %v3573_v44  ;;  %v1997_v47 = vrot.slane %v3517_v16, %v3578_v46  ;;  %v3039_v49 = vld [vmem:[%s664_s26] ss:$0 sm:$0xff]  ;;  %v2008_v51 = vrot.slane %v3517_v16, %v3587_v50 }
  0x1f   : > { %s3532_s4 = scalar_lea.vmem %s4429_s2, %s3005_s19  ;;  %1903 = vperm.xlu0 %3212, %v3039_v49   ;;  %v2019_v53 = vrot.slane %v3517_v16, %v3592_v52  ;;  %v2030_v55 = vrot.slane %v3517_v16, %v3597_v54  ;;  %v2041_v57 = vrot.slane %v3517_v16, %v3602_v56 }
  0x20   : > { %3152 = vmatpush3.bf16.msra.mxu0 %v3151_v8  ;;  %1977 = vbcast.lane.b32.xlu1 %v1975_v18, 256  ;;  %v1005_v24 = vld [vmem:[%s3532_s4] sm:$0xff]  ;;  %v1006_v28 = vld [vmem:[%s3532_s4 + $0x8] sm:$0xff]  ;;  %v1015_v30 = vld [vmem:[%s3532_s4 + $0x50] sm:$0xff] }
  0x21   : > { %3160 = vmatpush3.bf16.msra.mxu1 %v3151_v8  ;;  %3104 = vmatprep.subr.mxu0 %v3357_v1  ;;  %v1007_v31 = vld [vmem:[%s3532_s4 + $0x10] sm:$0xff]  ;;  %v1016_v32 = vld [vmem:[%s3532_s4 + $0x58] sm:$0xff]  ;;  %v1017_v34 = vld [vmem:[%s3532_s4 + $0x60] sm:$0xff] }
  0x22   : > { %3109 = vmatprep.subr.mxu1 %v923_v12  ;;  %v1008_v33 = vld [vmem:[%s3532_s4 + $0x18] sm:$0xff]  ;;  %v1009_v35 = vld [vmem:[%s3532_s4 + $0x20] sm:$0xff]  ;;  %v1018_v36 = vld [vmem:[%s3532_s4 + $0x68] sm:$0xff] }
  0x23   : > { %3091 = vmatmul.mubr.msk.f32.vlgmr.msra.gmra.mrb[0].mxu0 %vm691_vm0, %v684_v9  ;;  %v1010_v37 = vld [vmem:[%s3532_s4 + $0x28] sm:$0xff]  ;;  %v1019_v38 = vld [vmem:[%s3532_s4 + $0x70] sm:$0xff]  ;;  %v1020_v40 = vld [vmem:[%s3532_s4 + $0x78] sm:$0xff]  ;;  %2021 = vbcast.lane.b32.xlu0 %v2019_v53, 256 }
  0x24   : > { %3102 = vmatmul.mubr.msk.f32.vlgmr.msra.gmra.mrb[0].mxu1 %vm691_vm0, %v766_v10  ;;  %3105 = vmatpush3.msra.mxu0 %v848_v11  ;;  %v1011_v39 = vld [vmem:[%s3532_s4 + $0x30] sm:$0xff]  ;;  %v1012_v41 = vld [vmem:[%s3532_s4 + $0x38] sm:$0xff]  ;;  %v1013_v42 = vld [vmem:[%s3532_s4 + $0x40] sm:$0xff] }
  0x25   : > { %3106 = vmatprep.mubr.msk.f32.mxu0 %vm3356_vm1, %v3357_v1  ;;  %3114 = vmatprep.subr.mxu0 %v1021_v13  ;;  %v1014_v43 = vld [vmem:[%s3532_s4 + $0x48] sm:$0xff] }
  0x26   : > { %3110 = vmatpush3.msra.mxu1 %v923_v12  ;;  %1981 = vbcast.lane.b32.xlu1 %v1975_v18, 264 }
  0x27   : > { %3164 = vmatprep.subr.mxu1 %v1021_v13  ;;  %2032 = vbcast.lane.b32.xlu0 %v2030_v55, 256 }
  0x2a   : > { %1988 = vbcast.lane.b32.xlu1 %v1986_v45, 256 }
  0x2b   : > { %2043 = vbcast.lane.b32.xlu0 %v2041_v57, 256 }
  0x2e   : > { %1992 = vbcast.lane.b32.xlu1 %v1986_v45, 264 }
  0x32   : > { %1999 = vbcast.lane.b32.xlu1 %v1997_v47, 256 }
  0x36   : > { %2003 = vbcast.lane.b32.xlu1 %v1997_v47, 264 }
  0x3a   : > { %2010 = vbcast.lane.b32.xlu1 %v2008_v51, 256 }
  0x3e   : > { %2014 = vbcast.lane.b32.xlu1 %v2008_v51, 264 }
  0x42   : > { %2025 = vbcast.lane.b32.xlu1 %v2019_v53, 264 }
  0x46   : > { %2036 = vbcast.lane.b32.xlu1 %v2030_v55, 264 }
  0x4a   : > { %2047 = vbcast.lane.b32.xlu1 %v2041_v57, 264 }
  0xf6   : > { %v761_v20 = vpop.f32.mrb[0].mxu0 }
  0xf7   : > { %v762_v21 = vadd.f32 %v3014_v19, %v761_v20  ;;  %v3092_v22 = vpop.f32.mrb[1].mxu0  ;;  %v3103_v23 = vpop.f32.mrb[0].mxu1 }
  0xf8   : > { %v845_v25 = vadd.f32 %v3103_v23, %v3014_v19  ;;  %v839_v26 = vpop.f32.mrb[1].mxu1 }
  0xf9   : > { %v840_v27 = vadd.f32 %v3014_v19, %v839_v26  ;;  %3107 = vmatmul.mubr.msk.f32.vlgmr.msra.gmra.mrb[2].mxu0 %vm849_vm2, %v762_v21  ;;  %v3625_v26 = vld [vmem:[%s658_s20] ss:$0 sm:$0xff] }
  0xfa   : > { %3115 = vmatpush3.msra.mxu0 %v1021_v13  ;;  %3116 = vmatprep.mubr.msk.f32.mxu0 %vm849_vm2, %v1005_v24 }
  0xfb   : > { %v3162_v29 = vpack.c.bf16 %v845_v25, %v840_v27  ;;  %3111 = vmatprep.mubr.msk.f32.mxu1 %vm849_vm2, %v840_v27 }
  0xfc   : > { %3112 = vmatmul.mubr.msk.f32.vlgmr.msra.gmra.mrb[2].mxu1 %vm849_vm2, %v845_v25 }
  0xfd   : > { %3117 = vmatmul.mubr.msk.f32.vlgmr.msra.gmra.mrb[4].mxu0 %vm849_vm2, %v1006_v28  ;;  %3165 = vmatpush3.msra.mxu1 %v1021_v13 }
  0xfe   : > { %3131 = vmatprep.mubr.msk.f32.mxu1 %vm849_vm2, %v1015_v30  ;;  %3161 = vmatprep.subr.bf16.mxu1 %v3355_v0 }
  0xff   : > { %3119 = vmatprep.mubr.msk.f32.mxu0 %vm849_vm2, %v1007_v31 }
 0x100   : > { %3132 = vmatmul.mubr.msk.f32.vlgmr.msra.gmra.mrb[4].mxu1 %vm849_vm2, %v1016_v32 }
 0x101   : > { %3163 = vmatpush3.bf16.msra.mxu1 %v3162_v29  ;;  %3120 = vmatmul.mubr.msk.f32.gmra.mrb[6].mxu0 %vm849_vm2, %v1008_v33 }
 0x102   : > { %3134 = vmatprep.mubr.msk.f32.mxu1 %vm849_vm2, %v1017_v34  ;;  %3122 = vmatprep.mubr.msk.f32.mxu0 %vm849_vm2, %v1009_v35 }
 0x104   : > { %3135 = vmatmul.mubr.msk.f32.gmra.mrb[6].mxu1 %vm849_vm2, %v1018_v36 }
 0x105   : > { %3123 = vmatmul.mubr.msk.f32.gmra.mrb[8].mxu0 %vm849_vm2, %v1010_v37  ;;  %3137 = vmatprep.mubr.msk.f32.mxu1 %vm849_vm2, %v1019_v38 }
 0x106   : > { %3125 = vmatprep.mubr.msk.f32.mxu0 %vm849_vm2, %v1011_v39 }
 0x108   : > { %3138 = vmatmul.mubr.msk.f32.gmra.mrb[8].mxu1 %vm849_vm2, %v1020_v40 }
 0x109   : > { %3126 = vmatmul.mubr.msk.f32.gmra.mrb[10].mxu0 %vm849_vm2, %v1012_v41  ;;  %3144 = vmatprep.mubr.msk.f32.mxu1 %vm3356_vm1, %v3357_v1 }
 0x10a   : > { %3128 = vmatprep.mubr.msk.f32.mxu0 %vm849_vm2, %v1013_v42 }
 0x10d   : > { %3129 = vmatmul.mubr.msk.f32.gmra.mrb[12].mxu0 %vm849_vm2, %v1014_v43 }
 0x1cc   : > { %v919_v62 = vpop.f32.mrb[2].mxu0 }
 0x1cd   : > { %v1216_v63 = vcombine.high %v919_v62, %v919_v62  ;;  %v1223_v0 = vrot.slane %v919_v62, %v1222_v61  ;;  %v3108_v1 = vpop.f32.mrb[3].mxu0 }
 0x1cf   : > { %v1230_v2 = vrot.slane %v1216_v63, %v1222_v61  ;;  %v1231_v3 = vcombine.high %v1223_v0, %v1223_v0  ;;  %v1239_v4 = vrot.slane %v1223_v0, %v1222_v61  ;;  %v3607_v5 = vpop.f32.mrb[2].mxu1 }
 0x1d0   : > { %v3118_v6 = vpop.f32.mrb[4].mxu0  ;;  %v3609_v7 = vpop.f32.mrb[3].mxu1 }
 0x1d1   : > { %v1232_v8 = vcombine.high %v1230_v2, %v1230_v2  ;;  %v1246_v9 = vrot.slane %v1230_v2, %v1222_v61  ;;  %v3611_v10 = vrot.slane %v1231_v3, %v1222_v61  ;;  %v1261_v11 = vcombine.high %v1239_v4, %v1239_v4  ;;  %v1136_v12 = vpop.f32.mrb[5].mxu0 }
 0x1d2   : > { %v1268_v13 = vrot.slane %v1239_v4, %v3520_v17 }
 0x1d3   : > { %v1272_v16 = vrot.slane %v3611_v10, %v3520_v17  ;;  %v3133_v18 = vpop.f32.mrb[4].mxu1  ;;  %v3620_v19 = vrot.slane %v1232_v8, %v1222_v61  ;;  %v1262_v20 = vcombine.high %v1246_v9, %v1246_v9  ;;  %v1276_v21 = vrot.slane %v1261_v11, %v3520_v17 }
 0x1d4   : > { %v1306_v22 = vadd.f32 %v3607_v5, %v1268_v13  ;;  %v1305_v23 = vadd.f32 %v1268_v13, %v3609_v7  ;;  %v3121_v24 = vpop.f32.mrb[6].mxu0  ;;  %v1186_v25 = vpop.f32.mrb[5].mxu1 }
 0x1d5   : > { %v1308_v27 = vadd.f32 %v3607_v5, %v1272_v16  ;;  %v1146_v28 = vpop.f32.mrb[7].mxu0  ;;  %v1307_v29 = vadd.f32 %v1272_v16, %v3609_v7  ;;  %v1288_v30 = vrot.slane %v3620_v19, %v3520_v17  ;;  %v1292_v31 = vrot.slane %v1262_v20, %v3520_v17 }
 0x1d6   : > { %v1322_v32 = vadd.f32 %v3118_v6, %v1306_v22  ;;  %v1321_v33 = vadd.f32 %v1305_v23, %v1136_v12  ;;  %v3633_v34 = vadd.f32 %v3607_v5, %v1276_v21  ;;  %v3636_v35 = vadd.f32 %v1276_v21, %v3609_v7 }
 0x1d7   : > { %v1324_v36 = vadd.f32 %v3121_v24, %v1308_v27  ;;  %v1323_v37 = vadd.f32 %v1307_v29, %v1146_v28  ;;  %v1316_v38 = vadd.f32 %v3607_v5, %v1288_v30  ;;  %v1315_v39 = vadd.f32 %v1288_v30, %v3609_v7  ;;  %v3136_v40 = vpop.f32.mrb[6].mxu1 }
 0x1d8   : > { %v1345_v41 = vadd.f32 %v3625_v26, %v1322_v32  ;;  %v1344_v42 = vadd.f32 %v3625_v26, %v1321_v33  ;;  %v1318_v43 = vadd.f32 %v3607_v5, %v1292_v31  ;;  %v3643_v45 = vpop.f32.mrb[8].mxu0  ;;  %v3645_v47 = vpop.f32.mrb[7].mxu1  ;;  %v3648_v48 = vadd.f32 %v1292_v31, %v3609_v7 }
 0x1d9   : > { %v1347_v49 = vadd.f32 %v3625_v26, %v1324_v36  ;;  %v1346_v51 = vadd.f32 %v3625_v26, %v1323_v37  ;;  %v1332_v53 = vadd.f32 %v3133_v18, %v1316_v38  ;;  %v1331_v55 = vadd.f32 %v1315_v39, %v1186_v25  ;;  %v3652_v57 = vpop.f32.mrb[9].mxu0 }
 0x1da   : > { %v1361_v58 = vmul.f32 0.70710677, %v1345_v41  ;;  %v1360_v59 = vmul.f32 0.70710677, %v1344_v42  ;;  %v3671_v21 = vrot.slane %v1246_v9, %v3520_v17  ;;  %v3673_v22 = vmul.f32 0.5, %v1345_v41 }
 0x1db   : > { %v1363_v60 = vmul.f32 0.70710677, %v1347_v49  ;;  %v3654_v0 = vmul.f32 0.70710677, %v1346_v51  ;;  %v3656_v1 = vpop.f32.mrb[8].mxu1  ;;  %v3675_v23 = vmul.f32 0.5, %v1344_v42  ;;  %v1355_v29 = vadd.f32 %v3625_v26, %v1332_v53 }
 0x1dc   : > { %v1409_v61 = vand.u32 2147483647, %v1361_v58  ;;  %v1408_v62 = vand.u32 2147483647, %v1360_v59  ;;  %v3658_v8 = vpop.f32.mrb[10].mxu0  ;;  %v3666_v18 = vpop.f32.mrb[9].mxu1  ;;  %v1354_v37 = vadd.f32 %v3625_v26, %v1331_v55  ;;  %v1334_v42 = vadd.f32 %v3136_v40, %v1318_v43 }
 0x1dd   : > { %v1411_v63 = vand.u32 2147483647, %v1363_v60  ;;  %v3668_v20 = vpop.f32.mrb[11].mxu0  ;;  %v3677_v24 = vmul.f32 0.5, %v1347_v49  ;;  %v1410_v25 = vand.u32 2147483647, %v3654_v0 }
 0x1de   : > { %v1425_v2 = vmul.f32 0.3275911, %v1409_v61  ;;  %v1424_v3 = vmul.f32 0.3275911, %v1408_v62  ;;  %v1665_v4 = vsub.f32 0.0, %v1409_v61  ;;  %v1664_v16 = vsub.f32 0.0, %v1408_v62 }
 0x1df   : > { %v1427_v6 = vmul.f32 0.3275911, %v1411_v63  ;;  %vm1377_vm3 = vcmp.lt.f32.partialorder %v1361_v58, 0.0  ;;  %vm1376_vm4 = vcmp.lt.f32.partialorder %v1360_v59, 0.0  ;;  %v1667_v28 = vsub.f32 0.0, %v1411_v63 }
 0x1e0   : > { %v3662_v12 = vadd.f32 1.0, %v1425_v2  ;;  %v3664_v13 = vadd.f32 1.0, %v1424_v3  ;;  %v3680_v27 = vpop.f32.mrb[12].mxu0  ;;  %v1681_v9 = vmul.f32 %v1665_v4, %v1409_v61  ;;  %v1426_v32 = vmul.f32 0.3275911, %v1410_v25 }
 0x1e1   : > { %v3683_v30 = vpop.f32.mrb[13].mxu0  ;;  %v3686_v31 = vadd.f32 1.0, %v1427_v6  ;;  %v1680_v33 = vmul.f32 %v1664_v16, %v1408_v62  ;;  %v1371_v36 = vmul.f32 0.70710677, %v1355_v29  ;;  %v1666_v39 = vsub.f32 0.0, %v1410_v25 }
 0x1e2   : > { %3214 = vrcp.f32 %v3662_v12  ;;  %v3690_v38 = vadd.f32 1.0, %v1426_v32  ;;  %v3692_v41 = vmul.f32 0.5, %v1346_v51  ;;  %v4453_v49 = vmov 1.0  }
 0x1e3   : > { %3216 = vrcp.f32 %v3664_v13  ;;  %v3696_v53 = vsel %vm1377_vm3, -1.0, %v4453_v49  ;;  %v1683_v61 = vmul.f32 %v1667_v28, %v1411_v63  ;;  %v1419_v2 = vand.u32 2147483647, %v1371_v36 }
 0x1e4   : > { %v1370_v3 = vmul.f32 0.70710677, %v1354_v37  ;;  %v1698_v4 = vmul.f32 1.442695, %v1681_v9  ;;  %v3700_v62 = vsel %vm1376_vm4, -1.0, %v4453_v49  ;;  %vm1379_vm5 = vcmp.lt.f32.partialorder %v1363_v60, 0.0 }
 0x1e5   : > { %3218 = vrcp.f32 %v3686_v31  ;;  %v1696_v55 = vmul.f32 1.442695, %v1680_v33  ;;  %vm1378_vm6 = vcmp.lt.f32.partialorder %v3654_v0, 0.0  ;;  %v1435_v40 = vmul.f32 0.3275911, %v1419_v2 }
 0x1e6   : > { %v1675_v43 = vsub.f32 0.0, %v1419_v2  ;;  %3220 = vrcp.f32 %v3690_v38  ;;  %v1682_v51 = vmul.f32 %v1666_v39, %v1410_v25  ;;  %v1418_v58 = vand.u32 2147483647, %v1370_v3 }
 0x1e7   : > { %v1357_v63 = vadd.f32 %v3625_v26, %v1334_v42  ;;  %v3707_v6 = vsel %vm1379_vm5, -1.0, %v4453_v49  ;;  %v1702_v59 = vmul.f32 1.442695, %v1683_v61  ;;  %v1326_v60 = vadd.f32 %v3643_v45, %v3633_v34 }
 0x1e8   : > { %v1333_v16 = vadd.f32 %v3648_v48, %v3645_v47  ;;  %vm1387_vm7 = vcmp.lt.f32.partialorder %v1371_v36, 0.0  ;;  %v3713_v28 = vadd.f32 1.0, %v1435_v40  ;;  %v1434_v9 = vmul.f32 0.3275911, %v1418_v58 }
 0x1e9   : > { %v1373_v32 = vmul.f32 0.70710677, %v1357_v63  ;;  %3222 = vpow2.f32 %v1698_v4  ;;  %v3718_v25 = vsel %vm1378_vm6, -1.0, %v4453_v49  ;;  %v1691_v33 = vmul.f32 %v1675_v43, %v1419_v2 }
 0x1ea   : > { %v1349_v39 = vadd.f32 %v3625_v26, %v1326_v60  ;;  %3224 = vpow2.f32 %v1696_v55  ;;  %v1700_v34 = vmul.f32 1.442695, %v1682_v51  ;;  %v3721_v45 = vmul.f32 0.5, %v1355_v29 }
 0x1eb   : > { %v1674_v47 = vsub.f32 0.0, %v1418_v58  ;;  %3226 = vpow2.f32 %v1702_v59  ;;  %v3724_v36 = vsel %vm1387_vm7, -1.0, %v4453_v49  ;;  %v3726_v61 = vadd.f32 1.0, %v1434_v9 }
 0x1ec   : > { %v3215_v42 = vpop.eup %3214  ;;  %4483 = vst [vmem:[#allocation11_spill] sm:$0xff] %v3721_v45  ;;  %4484 = vst [vmem:[#allocation12_spill] sm:$0xff] %v3724_v36  ;;  %v1421_v4 = vand.u32 2147483647, %v1373_v32  ;;  %3228 = vrcp.f32 %v3713_v28  ;;  %vm1386_vm8 = vcmp.lt.f32.partialorder %v1370_v3, 0.0  ;;  %v1356_v2 = vadd.f32 %v3625_v26, %v1333_v16 }
 0x1ed   : > { %v3217_v48 = vpop.eup %3216  ;;  %v1365_v0 = vmul.f32 0.70710677, %v1349_v39  ;;  %v1473_v55 = vmul.f32 %v3215_v42, %v3662_v12  ;;  %v1718_v40 = vmul.f32 1.442695, %v1691_v33  ;;  %3230 = vpow2.f32 %v1700_v34 }
 0x1ee   : > { %v1437_v29 = vmul.f32 0.3275911, %v1421_v4  ;;  %v1677_v43 = vsub.f32 0.0, %v1421_v4  ;;  %v1472_v59 = vmul.f32 %v3217_v48, %v3664_v13  ;;  %v1690_v60 = vmul.f32 %v1674_v47, %v1418_v58 }
 0x1ef   : > { %v3219_v51 = vpop.eup %3218  ;;  %v3732_v14 = vmul.f32 0.5, %v1354_v37  ;;  %v3735_v9 = vsel %vm1386_vm8, -1.0, %v4453_v49  ;;  %3232 = vrcp.f32 %v3726_v61  ;;  %v3740_v16 = vmul.f32 0.5, %v1357_v63 }
 0x1f0   : > { %v3738_v3 = vadd.f32 1.0, %v1437_v29  ;;  %v3221_v12 = vpop.eup %3220  ;;  %vm1389_vm9 = vcmp.lt.f32.partialorder %v1373_v32, 0.0  ;;  %v1693_v33 = vmul.f32 %v1677_v43, %v1421_v4  ;;  %v1413_v11 = vand.u32 2147483647, %v1365_v0 }
 0x1f1   : > { %4485 = vst [vmem:[#allocation13_spill] sm:$0xff] %v3740_v16  ;;  %v1372_v56 = vmul.f32 0.70710677, %v1356_v2  ;;  %v1489_v54 = vsub.f32 2.0, %v1473_v55  ;;  %v1475_v13 = vmul.f32 %v3219_v51, %v3686_v31  ;;  %3234 = vpow2.f32 %v1718_v40 }
 0x1f2   : > { %v1325_v37 = vadd.f32 %v3636_v35, %v3652_v57  ;;  %v1488_v58 = vsub.f32 2.0, %v1472_v59  ;;  %v1716_v34 = vmul.f32 1.442695, %v1690_v60  ;;  %3236 = vrcp.f32 %v3738_v3 }
 0x1f3   : > { %v1429_v47 = vmul.f32 0.3275911, %v1413_v11  ;;  %v3746_v29 = vpop.eup %3222  ;;  %v1474_v63 = vmul.f32 %v3221_v12, %v3690_v38  ;;  %vm1381_vm10 = vcmp.lt.f32.partialorder %v1365_v0, 0.0  ;;  %v1420_v4 = vand.u32 2147483647, %v1372_v56 }
 0x1f4   : > { %v3750_v43 = vadd.f32 %v3625_v26, %v1325_v37  ;;  %v3752_v55 = vpop.eup %3224  ;;  %v3756_v31 = vsel %vm1389_vm9, -1.0, %v4453_v49  ;;  %v1722_v35 = vmul.f32 1.442695, %v1693_v33  ;;  %v3760_v40 = vmul.f32 0.5, %v1349_v39 }
 0x1f5   : > { %4486 = vst [vmem:[#allocation14_spill] sm:$0xff] %v3756_v31  ;;  %v3758_v57 = vadd.f32 1.0, %v1429_v47  ;;  %v3762_v59 = vpop.eup %3226  ;;  %v3764_v60 = vmul.f32 %v3215_v42, %v1489_v54  ;;  %v1491_v38 = vsub.f32 2.0, %v1475_v13  ;;  %v1436_v50 = vmul.f32 0.3275911, %v1420_v4 }
 0x1f6   : > { %v3767_v37 = vmul.f32 0.70710677, %v3750_v43  ;;  %v3229_v46 = vpop.eup %3228  ;;  %v3769_v52 = vmul.f32 %v3217_v48, %v1488_v58  ;;  %3238 = vpow2.f32 %v1716_v34  ;;  %v3773_v32 = vsel %vm1381_vm10, -1.0, %v4453_v49 }
 0x1f7   : > { %v1669_v33 = vsub.f32 0.0, %v1413_v11  ;;  %v1490_v39 = vsub.f32 2.0, %v1474_v63  ;;  %3240 = vrcp.f32 %v3758_v57  ;;  %v3776_v47 = vadd.f32 1.0, %v1436_v50  ;;  %v3780_v42 = vpop.eup %3230 }
 0x1f8   : > { %v3778_v54 = vmul.f32 0.5, %v1356_v2  ;;  %3242 = vpow2.f32 %v1722_v35  ;;  %vm1388_vm11 = vcmp.lt.f32.partialorder %v1372_v56, 0.0  ;;  %v1676_v13 = vsub.f32 0.0, %v1420_v4 }
 0x1f9   : > { %v1412_v48 = vand.u32 2147483647, %v3767_v37  ;;  %v3233_v58 = vpop.eup %3232  ;;  %v3783_v34 = vmul.f32 %v3219_v51, %v1491_v38  ;;  %v1483_v0 = vmul.f32 %v3229_v46, %v3713_v28  ;;  %3244 = vrcp.f32 %v3776_v47 }
 0x1fa   : > { %v1264_v50 = vcombine.high %v3620_v19, %v3620_v19  ;;  %v1685_v63 = vmul.f32 %v1669_v33, %v1413_v11  ;;  %v4487_v35 = vcombine.high %v3611_v10, %v3611_v10  ;;  %v1314_v49 = vadd.f32 %v3607_v5, %v3671_v21 }
 0x1fb   : > { %v1428_v2 = vmul.f32 0.3275911, %v1412_v48  ;;  %v3795_v44 = vpop.eup %3234  ;;  %v3797_v51 = vmul.f32 %v3221_v12, %v1490_v39  ;;  %v4489_v28 = vmov 1.0   ;;  %v1313_v19 = vadd.f32 %v3671_v21, %v3609_v7 }
 0x1fc   : > { %v1280_v56 = vrot.slane %v4487_v35, %v3520_v17  ;;  %4488 = vst [vmem:[#allocation15_spill] sm:$0xff] %v3795_v44  ;;  %v3800_v38 = vsel %vm1388_vm11, -1.0, %v4489_v28  ;;  %v1296_v15 = vrot.slane %v1264_v50, %v3520_v17  ;;  %v3237_v11 = vpop.eup %3236  ;;  %v1482_v33 = vmul.f32 %v3233_v58, %v3726_v61 }
 0x1fd   : > { %v1692_v10 = vmul.f32 %v1676_v13, %v1420_v4  ;;  %v1668_v35 = vsub.f32 0.0, %v1412_v48  ;;  %v1330_v45 = vadd.f32 %v3680_v27, %v1314_v49  ;;  %v1499_v36 = vsub.f32 2.0, %v1483_v0 }
 0x1fe   : > { %v1312_v16 = vadd.f32 %v3607_v5, %v1280_v56  ;;  %v1320_v31 = vadd.f32 %v3607_v5, %v1296_v15  ;;  %v1319_v12 = vadd.f32 %v1296_v15, %v3609_v7  ;;  %v1311_v39 = vadd.f32 %v1280_v56, %v3609_v7 }
 0x1ff   : > { %v1706_v50 = vmul.f32 1.442695, %v1685_v63  ;;  %v3811_v17 = vadd.f32 1.0, %v1428_v2  ;;  %v1485_v61 = vmul.f32 %v3237_v11, %v3738_v3  ;;  %vm1380_vm12 = vcmp.lt.f32.partialorder %v3767_v37, 0.0 }
 0x200   : > { %v1328_v21 = vadd.f32 %v3658_v8, %v1312_v16  ;;  %v1336_v4 = vadd.f32 %v3656_v1, %v1320_v31  ;;  %v1335_v13 = vadd.f32 %v1319_v12, %v3666_v18  ;;  %v1327_v5 = vadd.f32 %v1311_v39, %v3668_v20  ;;  %v3818_v44 = vpop.eup %3238 }
 0x201   : > { %v1684_v15 = vmul.f32 %v1668_v35, %v1412_v48  ;;  %v3825_v27 = vadd.f32 %v1313_v19, %v3683_v30  ;;  %v3241_v8 = vpop.eup %3240  ;;  %v1498_v49 = vsub.f32 2.0, %v1482_v33  ;;  %v1720_v3 = vmul.f32 1.442695, %v1692_v10 }
 0x202   : > { %v3822_v7 = vadd.f32 %v3625_v26, %v1328_v21  ;;  %v1359_v1 = vadd.f32 %v3625_v26, %v1336_v4  ;;  %v1358_v18 = vadd.f32 %v3625_v26, %v1335_v13  ;;  %v3829_v16 = vpop.eup %3242  ;;  %v3831_v20 = vmul.f32 %v3229_v46, %v1499_v36 }
 0x203   : > { %3246 = vrcp.f32 %v3811_v17  ;;  %v3835_v31 = vmul.f32 0.5, %v3750_v43  ;;  %v3245_v30 = vpop.eup %3244  ;;  %v1501_v0 = vsub.f32 2.0, %v1485_v61  ;;  %v1477_v56 = vmul.f32 %v3241_v8, %v3758_v57 }
 0x204   : > { %4490 = vst [vmem:[#allocation16_spill] sm:$0xff] %v3822_v7  ;;  %v3838_v48 = vmul.f32 0.70710677, %v3822_v7  ;;  %3248 = vpow2.f32 %v1706_v50  ;;  %v1375_v63 = vmul.f32 0.70710677, %v1359_v1  ;;  %v3844_v46 = vsel %vm1380_vm12, -1.0, %v4489_v28 }
 0x205   : > { %4491 = vst [vmem:[#allocation17_spill] sm:$0xff] %v3835_v31  ;;  %v1374_v2 = vmul.f32 0.70710677, %v1358_v18  ;;  %4492 = vst [vmem:[#allocation18_spill] sm:$0xff] %v3844_v46  ;;  %v1704_v36 = vmul.f32 1.442695, %v1684_v15  ;;  %v3847_v43 = vmul.f32 %v3233_v58, %v1498_v49  ;;  %3250 = vpow2.f32 %v1720_v3 }
 0x206   : > { %v1415_v19 = vand.u32 2147483647, %v3838_v48  ;;  %v1423_v33 = vand.u32 2147483647, %v1375_v63  ;;  %v3850_v10 = vadd.f32 %v3625_v26, %v1330_v45  ;;  %v1484_v35 = vmul.f32 %v3245_v30, %v3776_v47 }
 0x207   : > { %v3854_v57 = vadd.f32 %v3625_v26, %v1327_v5  ;;  %v3856_v37 = vmul.f32 %v3237_v11, %v1501_v0  ;;  %v1422_v61 = vand.u32 2147483647, %v1374_v2  ;;  %v1493_v4 = vsub.f32 2.0, %v1477_v56 }
 0x208   : > { %4493 = vst [vmem:[#allocation19_spill] sm:$0xff] %v3850_v10  ;;  %v1431_v12 = vmul.f32 0.3275911, %v1415_v19  ;;  %v1671_v39 = vsub.f32 0.0, %v1415_v19  ;;  %v1439_v50 = vmul.f32 0.3275911, %v1423_v33  ;;  %3252 = vpow2.f32 %v1704_v36 }
 0x209   : > { %4494 = vst [vmem:[#allocation20_spill] sm:$0xff] %v3854_v57  ;;  %v1679_v21 = vsub.f32 0.0, %v1423_v33  ;;  %vm1391_vm13 = vcmp.lt.f32.partialorder %v1375_v63, 0.0  ;;  %v1438_v49 = vmul.f32 0.3275911, %v1422_v61  ;;  %v1500_v3 = vsub.f32 2.0, %v1484_v35 }
 0x20a   : > { %v1447_v58 = vadd.f32 1.0, %v1431_v12  ;;  %v1687_v13 = vmul.f32 %v1671_v39, %v1415_v19  ;;  %v1455_v15 = vadd.f32 1.0, %v1439_v50  ;;  %v1678_v47 = vsub.f32 0.0, %v1422_v61 }
 0x20b   : > { %v1695_v45 = vmul.f32 %v1679_v21, %v1423_v33  ;;  %v3859_v7 = vmul.f32 0.70710677, %v3854_v57  ;;  %v3861_v11 = vmul.f32 0.5, %v1359_v1  ;;  %v1454_v5 = vadd.f32 1.0, %v1438_v49 }
 0x20c   : > { %3254 = vrcp.f32 %v1447_v58  ;;  %v3864_v0 = vmul.f32 0.70710677, %v3850_v10  ;;  %v1710_v36 = vmul.f32 1.442695, %v1687_v13  ;;  %v1694_v19 = vmul.f32 %v1678_v47, %v1422_v61 }
 0x20d   : > { %4495 = vst [vmem:[#allocation21_spill] sm:$0xff] %v3859_v7  ;;  %3256 = vrcp.f32 %v1455_v15  ;;  %4496 = vst [vmem:[#allocation22_spill] sm:$0xff] %v3861_v11  ;;  %v3247_v56 = vpop.eup %3246  ;;  %v3866_v12 = vmul.f32 0.5, %v1358_v18  ;;  %v1414_v33 = vand.u32 2147483647, %v3859_v7  ;;  %v3871_v39 = vmul.f32 %v3241_v8, %v1493_v4 }
 0x20e   : > { %4497 = vst [vmem:[#allocation23_spill] sm:$0xff] %v3864_v0  ;;  %v3869_v35 = vpop.eup %3248  ;;  %v3875_v50 = vsel %vm1391_vm13, -1.0, %v4489_v28  ;;  %v1726_v1 = vmul.f32 1.442695, %v1695_v45  ;;  %vm1390_vm14 = vcmp.lt.f32.partialorder %v1374_v2, 0.0  ;;  %v3877_v21 = vmul.f32 %v3245_v30, %v1500_v3 }
 0x20f   : > { %4498 = vst [vmem:[#allocation24_spill] sm:$0xff] %v3866_v12  ;;  %4499 = vst [vmem:[#allocation25_spill] sm:$0xff] %v3875_v50  ;;  %3258 = vrcp.f32 %v1454_v5  ;;  %v1430_v49 = vmul.f32 0.3275911, %v1414_v33  ;;  %v1670_v13 = vsub.f32 0.0, %v1414_v33  ;;  %v3879_v61 = vpop.eup %3250  ;;  %v1476_v18 = vmul.f32 %v3247_v56, %v3811_v17 }
 0x210   : > { %v1417_v47 = vand.u32 2147483647, %v3864_v0  ;;  %v3885_v8 = vadd.f32 %v3625_v26, %v3825_v27  ;;  %v1520_v63 = vmul.f32 1.0614054, %v3769_v52  ;;  %3260 = vpow2.f32 %v1710_v36 }
 0x211   : > { %v1724_v4 = vmul.f32 1.442695, %v1694_v19  ;;  %v1446_v45 = vadd.f32 1.0, %v1430_v49  ;;  %v1686_v30 = vmul.f32 %v1670_v13, %v1414_v33  ;;  %3262 = vpow2.f32 %v1726_v1 }
 0x212   : > { %4500 = vst [vmem:[#allocation26_spill] sm:$0xff] %v3885_v8  ;;  %v1433_v3 = vmul.f32 0.3275911, %v1417_v47  ;;  %v1673_v10 = vsub.f32 0.0, %v1417_v47  ;;  %v3889_v11 = vmul.f32 0.70710677, %v3885_v8  ;;  %v3891_v57 = vpop.eup %3252 }
 0x213   : > { %v3895_v17 = vsel %vm1390_vm14, -1.0, %v4489_v28  ;;  %3264 = vrcp.f32 %v1446_v45  ;;  %v1536_v26 = vadd.f32 -1.4531521, %v1520_v63  ;;  %v1522_v27 = vmul.f32 1.0614054, %v3797_v51 }
 0x214   : > { %4501 = vst [vmem:[#allocation27_spill] sm:$0xff] %v3889_v11  ;;  %4502 = vst [vmem:[#allocation28_spill] sm:$0xff] %v3895_v17  ;;  %v1708_v36 = vmul.f32 1.442695, %v1686_v30  ;;  %v1449_v19 = vadd.f32 1.0, %v1433_v3  ;;  %v1689_v49 = vmul.f32 %v1673_v10, %v1417_v47  ;;  %v1492_v13 = vsub.f32 2.0, %v1476_v18 }
 0x215   : > { %v1416_v33 = vand.u32 2147483647, %v3889_v11  ;;  %3266 = vpow2.f32 %v1724_v4  ;;  %v1552_v0 = vmul.f32 %v1536_v26, %v3769_v52  ;;  %v1538_v8 = vadd.f32 -1.4531521, %v1522_v27 }
 0x216   : > { %v3255_v1 = vpop.eup %3254  ;;  %3268 = vrcp.f32 %v1449_v19  ;;  %v1714_v2 = vmul.f32 1.442695, %v1689_v49  ;;  %v1521_v18 = vmul.f32 1.0614054, %v3764_v60  ;;  %v3905_v11 = vmul.f32 %v3247_v56, %v1492_v13 }
 0x217   : > { %v3257_v50 = vpop.eup %3256  ;;  %v1479_v12 = vmul.f32 %v3255_v1, %v1447_v58  ;;  %v1432_v28 = vmul.f32 0.3275911, %v1416_v33  ;;  %v1672_v63 = vsub.f32 0.0, %v1416_v33  ;;  %v1568_v31 = vadd.f32 1.4214138, %v1552_v0 }
 0x218   : > { %v1487_v17 = vmul.f32 %v3257_v50, %v1455_v15  ;;  %v1554_v30 = vmul.f32 %v1538_v8, %v3797_v51  ;;  %3270 = vpow2.f32 %v1708_v36  ;;  %v1537_v15 = vadd.f32 -1.4531521, %v1521_v18 }
 0x219   : > { %v1495_v3 = vsub.f32 2.0, %v1479_v12  ;;  %v3901_v10 = vadd.f32 1.0, %v1432_v28  ;;  %v3259_v47 = vpop.eup %3258  ;;  %v1688_v26 = vmul.f32 %v1672_v63, %v1416_v33  ;;  %v1584_v27 = vmul.f32 %v1568_v31, %v3769_v52 }
 0x21a   : > { %v1503_v4 = vsub.f32 2.0, %v1487_v17  ;;  %v1570_v58 = vadd.f32 1.4214138, %v1554_v30  ;;  %v1486_v49 = vmul.f32 %v3259_v47, %v1454_v5  ;;  %3272 = vpow2.f32 %v1714_v2  ;;  %v3907_v0 = vpop.eup %3260 }
 0x21b   : > { %4503 = vst [vmem:[#allocation29_spill] sm:$0xff] %v3907_v0  ;;  %v3909_v8 = vmul.f32 %v3255_v1, %v1495_v3  ;;  %3274 = vrcp.f32 %v3901_v10  ;;  %v1600_v28 = vadd.f32 -0.28449672, %v1584_v27  ;;  %v3913_v36 = vpop.eup %3262  ;;  %v1553_v31 = vmul.f32 %v1537_v15, %v3764_v60 }
 0x21c   : > { %v1586_v12 = vmul.f32 %v1570_v58, %v3797_v51  ;;  %4504 = vst [vmem:[#allocation30_spill] sm:$0xff] %v3913_v36  ;;  %v3915_v17 = vmul.f32 %v3257_v50, %v1503_v4  ;;  %v1523_v56 = vmul.f32 1.0614054, %v3783_v34  ;;  %v1530_v5 = vmul.f32 1.0614054, %v3847_v43 }
 0x21d   : > { %v3265_v33 = vpop.eup %3264  ;;  %v1712_v13 = vmul.f32 1.442695, %v1688_v26  ;;  %v1616_v1 = vmul.f32 %v1600_v28, %v3769_v52  ;;  %v1525_v63 = vmul.f32 1.0614054, %v3871_v39  ;;  %v1502_v30 = vsub.f32 2.0, %v1486_v49 }
 0x21e   : > { %v1602_v2 = vadd.f32 -0.28449672, %v1586_v12  ;;  %v1478_v3 = vmul.f32 %v3265_v33, %v1446_v45  ;;  %v1569_v18 = vadd.f32 1.4214138, %v1553_v31  ;;  %v1539_v27 = vadd.f32 -1.4531521, %v1523_v56 }
 0x21f   : > { %v3922_v58 = vpop.eup %3266  ;;  %v1632_v50 = vadd.f32 0.2548296, %v1616_v1  ;;  %v1546_v15 = vadd.f32 -1.4531521, %v1530_v5  ;;  %v1541_v0 = vadd.f32 -1.4531521, %v1525_v63  ;;  %3276 = vpow2.f32 %v1712_v13 }
 0x220   : > { %4505 = vst [vmem:[#allocation31_spill] sm:$0xff] %v3922_v58  ;;  %v1618_v4 = vmul.f32 %v1602_v2, %v3797_v51  ;;  %v3269_v36 = vpop.eup %3268  ;;  %v1494_v46 = vsub.f32 2.0, %v1478_v3  ;;  %v1585_v26 = vmul.f32 %v1569_v18, %v3764_v60  ;;  %v1555_v28 = vmul.f32 %v1539_v27, %v3783_v34 }
 0x221   : > { %v1532_v12 = vmul.f32 1.0614054, %v3877_v21  ;;  %v1481_v7 = vmul.f32 %v3269_v36, %v1449_v19  ;;  %v1648_v45 = vmul.f32 %v1632_v50, %v3769_v52  ;;  %v1562_v31 = vmul.f32 %v1546_v15, %v3847_v43 }
 0x222   : > { %v1634_v49 = vadd.f32 0.2548296, %v1618_v4  ;;  %v3930_v56 = vpop.eup %3270  ;;  %v1601_v1 = vadd.f32 -0.28449672, %v1585_v26  ;;  %v1571_v5 = vadd.f32 1.4214138, %v1555_v28  ;;  %v1557_v2 = vmul.f32 %v1541_v0, %v3871_v39 }
 0x223   : > { %v1497_v63 = vsub.f32 2.0, %v1481_v7  ;;  %v1728_v3 = vmul.f32 %v3752_v55, %v1648_v45  ;;  %v1578_v27 = vadd.f32 1.4214138, %v1562_v31  ;;  %v1548_v13 = vadd.f32 -1.4531521, %v1532_v12 }
 0x224   : > { %v1650_v18 = vmul.f32 %v1634_v49, %v3797_v51  ;;  %v3935_v58 = vpop.eup %3272  ;;  %v1617_v52 = vmul.f32 %v1601_v1, %v3764_v60  ;;  %v1587_v19 = vmul.f32 %v1571_v5, %v3783_v34  ;;  %v1573_v50 = vadd.f32 1.4214138, %v1557_v2 }
 0x225   : > { %v3939_v4 = vpop.eup %3274  ;;  %v3941_v15 = vmul.f32 %v3259_v47, %v1502_v30  ;;  %v3943_v7 = vmul.f32 %v3265_v33, %v1494_v46  ;;  %v1744_v55 = vsub.f32 1.0, %v1728_v3  ;;  %v1594_v28 = vmul.f32 %v1578_v27, %v3847_v43 }
 0x226   : > { %v1730_v51 = vmul.f32 %v3780_v42, %v1650_v18  ;;  %v1633_v0 = vadd.f32 0.2548296, %v1617_v52  ;;  %v1603_v26 = vadd.f32 -0.28449672, %v1587_v19  ;;  %v1589_v45 = vmul.f32 %v1573_v50, %v3871_v39 }
 0x227   : > { %v3948_v49 = vmul.f32 %v3269_v36, %v1497_v63  ;;  %v1760_v47 = vmul.f32 %v1744_v55, %v3700_v62  ;;  %v1564_v46 = vmul.f32 %v1548_v13, %v3877_v21  ;;  %v1610_v12 = vadd.f32 -0.28449672, %v1594_v28  ;;  %v3963_v63 = vld [vmem:[%s661_s24] ss:$0 sm:$0xff] }
 0x228   : > { %v1746_v30 = vsub.f32 1.0, %v1730_v51  ;;  %v1649_v33 = vmul.f32 %v1633_v0, %v3764_v60  ;;  %v1619_v42 = vmul.f32 %v1603_v26, %v3783_v34  ;;  %v1605_v31 = vadd.f32 -0.28449672, %v1589_v45 }
 0x229   : > { %v3960_v1 = vmul.f32 %v3939_v4, %v3901_v10  ;;  %v1792_v36 = vadd.f32 1.0, %v1760_v47  ;;  %v1580_v2 = vadd.f32 1.4214138, %v1564_v46  ;;  %v1626_v18 = vmul.f32 %v1610_v12, %v3847_v43  ;;  %v3971_v50 = vpop.eup %3276 }
 0x22a   : > { %v1762_v5 = vmul.f32 %v1746_v30, %v3718_v25  ;;  %v1729_v62 = vmul.f32 %v3746_v29, %v1649_v33  ;;  %v1635_v3 = vadd.f32 0.2548296, %v1619_v42  ;;  %v1621_v60 = vmul.f32 %v1605_v31, %v3871_v39 }
 0x22b   : > { %v1808_v27 = vmul.f32 %v1792_v36, %v3675_v23  ;;  %v1596_v19 = vmul.f32 %v1580_v2, %v3877_v21  ;;  %v1531_v10 = vmul.f32 1.0614054, %v3831_v20  ;;  %v1642_v55 = vadd.f32 0.2548296, %v1626_v18 }
 0x22c   : > { %v1794_v52 = vadd.f32 1.0, %v1762_v5  ;;  %v1745_v25 = vsub.f32 1.0, %v1729_v62  ;;  %v1651_v13 = vmul.f32 %v1635_v3, %v3783_v34  ;;  %v1637_v51 = vadd.f32 0.2548296, %v1621_v60 }
 0x22d   : > { %v1831_v29 = vmul.f32 %v3963_v63, %v1808_v27  ;;  %v1612_v26 = vadd.f32 -0.28449672, %v1596_v19  ;;  %v1547_v28 = vadd.f32 -1.4531521, %v1531_v10  ;;  %v1658_v47 = vmul.f32 %v1642_v55, %v3847_v43 }
 0x22e   : > { %v1810_v0 = vmul.f32 %v1794_v52, %v3692_v41  ;;  %v1761_v23 = vmul.f32 %v1745_v25, %v3696_v53  ;;  %v1731_v45 = vmul.f32 %v3762_v59, %v1651_v13  ;;  %v1653_v30 = vmul.f32 %v1637_v51, %v3871_v39 }
 0x22f   : > { %v1848_v46 = vsel %vm1847_vm15, %v1831_v29, 0.0  ;;  %v1628_v33 = vmul.f32 %v1612_v26, %v3877_v21  ;;  %v1563_v42 = vmul.f32 %v1547_v28, %v3831_v20  ;;  %v1738_v31 = vmul.f32 %v3818_v44, %v1658_v47 }
 0x230   : > { %v1833_v34 = vmul.f32 %v3963_v63, %v1810_v0  ;;  %1849 = vadd.xlane.f32.xlu0 %v1848_v46  ;;  %v1793_v41 = vadd.f32 1.0, %v1761_v23  ;;  %v1747_v12 = vsub.f32 1.0, %v1731_v45  ;;  %v1733_v53 = vmul.f32 %v3869_v35, %v1653_v30 }
 0x231   : > { %v1496_v59 = vsub.f32 2.0, %v3960_v1  ;;  %v1644_v39 = vadd.f32 0.2548296, %v1628_v33  ;;  %v1579_v36 = vadd.f32 1.4214138, %v1563_v42  ;;  %v1754_v62 = vsub.f32 1.0, %v1738_v31 }
 0x232   : > { %v1854_v43 = vsel %vm1847_vm15, %v1833_v34, 0.0  ;;  %v1809_v5 = vmul.f32 %v1793_v41, %v3673_v22  ;;  %v1763_v2 = vmul.f32 %v1747_v12, %v3707_v6  ;;  %v1749_v3 = vsub.f32 1.0, %v1733_v53 }
 0x233   : > { %1855 = vadd.xlane.f32.xlu1 %v1854_v43  ;;  %v1660_v18 = vmul.f32 %v1644_v39, %v3877_v21  ;;  %v1595_v60 = vmul.f32 %v1579_v36, %v3831_v20  ;;  %v1524_v44 = vmul.f32 1.0614054, %v3905_v11  ;;  %v1533_v35 = vmul.f32 1.0614054, %v3856_v37  ;;  %v4506_v36 = vld [vmem:[#allocation15_spill] sm:$0xff] }
 0x234   : > { %v1832_v1 = vmul.f32 %v3963_v63, %v1809_v5  ;;  %v1795_v27 = vadd.f32 1.0, %v1763_v2  ;;  %v1770_v52 = vmul.f32 %v1754_v62, %v3735_v9  ;;  %v1765_v19 = vmul.f32 %v1749_v3, %v3773_v32 }
 0x235   : > { %v1740_v22 = vmul.f32 %v3879_v61, %v1660_v18  ;;  %v1611_v6 = vadd.f32 -0.28449672, %v1595_v60  ;;  %v1540_v10 = vadd.f32 -1.4531521, %v1524_v44  ;;  %v1549_v25 = vadd.f32 -1.4531521, %v1533_v35 }
 0x236   : > { %v1851_v21 = vsel %vm1847_vm15, %v1832_v1, 0.0  ;;  %v1811_v13 = vmul.f32 %v1795_v27, %v3677_v24  ;;  %v1802_v55 = vadd.f32 1.0, %v1770_v52  ;;  %v1797_v51 = vadd.f32 1.0, %v1765_v19 }
 0x237   : > { %1852 = vadd.xlane.f32.xlu0 %v1851_v21  ;;  %v1756_v29 = vsub.f32 1.0, %v1740_v22  ;;  %v1627_v0 = vmul.f32 %v1611_v6, %v3831_v20  ;;  %v1556_v26 = vmul.f32 %v1540_v10, %v3905_v11  ;;  %v1565_v9 = vmul.f32 %v1549_v25, %v3856_v37  ;;  %v4507_v22 = vld [vmem:[#allocation12_spill] sm:$0xff] }
 0x238   : > { %v1834_v32 = vmul.f32 %v3963_v63, %v1811_v13  ;;  %v1818_v61 = vmul.f32 %v1802_v55, %v3732_v14  ;;  %v1813_v28 = vmul.f32 %v1797_v51, %v3760_v40  ;;  %v1534_v23 = vmul.f32 1.0614054, %v3941_v15 }
 0x239   : > { %v1772_v24 = vmul.f32 %v1756_v29, %v3800_v38  ;;  %v1643_v45 = vadd.f32 0.2548296, %v1627_v0  ;;  %v1572_v47 = vadd.f32 1.4214138, %v1556_v26  ;;  %v1581_v30 = vadd.f32 1.4214138, %v1565_v9 }
 0x23a   : > { %v1857_v46 = vsel %vm1847_vm15, %v1834_v32, 0.0  ;;  %v1841_v34 = vmul.f32 %v3963_v63, %v1818_v61  ;;  %v1836_v33 = vmul.f32 %v3963_v63, %v1813_v28  ;;  %v1550_v42 = vadd.f32 -1.4531521, %v1534_v23 }
 0x23b   : > { %1858 = vadd.xlane.f32.xlu1 %v1857_v46  ;;  %v1804_v41 = vadd.f32 1.0, %v1772_v24  ;;  %v1659_v14 = vmul.f32 %v1643_v45, %v3831_v20  ;;  %v1588_v40 = vmul.f32 %v1572_v47, %v3905_v11  ;;  %v1597_v12 = vmul.f32 %v1581_v30, %v3856_v37  ;;  %v4508_v24 = vld [vmem:[#allocation11_spill] sm:$0xff] }
 0x23c   : > { %v1878_v38 = vsel %vm1847_vm15, %v1841_v34, 0.0  ;;  %v1863_v31 = vsel %vm1847_vm15, %v1836_v33, 0.0  ;;  %v1566_v53 = vmul.f32 %v1550_v42, %v3941_v15  ;;  %v1535_v43 = vmul.f32 1.0614054, %v3915_v17 }
 0x23d   : > { %1879 = vadd.xlane.f32.xlu0 %v1878_v38  ;;  %v1820_v39 = vmul.f32 %v1804_v41, %v3778_v54  ;;  %v1739_v5 = vmul.f32 %v4506_v36, %v1659_v14  ;;  %v1604_v2 = vadd.f32 -0.28449672, %v1588_v40  ;;  %v1613_v62 = vadd.f32 -0.28449672, %v1597_v12  ;;  %v4509_v12 = vld [vmem:[#allocation21_spill] sm:$0xff]  ;;  %v4511_v36 = vld [vmem:[#allocation14_spill] sm:$0xff] }
 0x23e   : > { %v4021_v20 = vmul.f32 %v3939_v4, %v1496_v59  ;;  %v1582_v3 = vadd.f32 1.4214138, %v1566_v53  ;;  %v1551_v18 = vadd.f32 -1.4531521, %v1535_v43  ;;  %v1526_v60 = vmul.f32 1.0614054, %v3943_v7 }
 0x23f   : > { %1864 = vadd.xlane.f32.xlu1 %v1863_v31  ;;  %v1843_v44 = vmul.f32 %v3963_v63, %v1820_v39  ;;  %v1755_v35 = vsub.f32 1.0, %v1739_v5  ;;  %v1620_v1 = vmul.f32 %v1604_v2, %v3905_v11  ;;  %v1629_v27 = vmul.f32 %v1613_v62, %v3856_v37  ;;  %v4510_v43 = vld [vmem:[#allocation18_spill] sm:$0xff]  ;;  %v4512_v62 = vld [vmem:[#allocation31_spill] sm:$0xff] }
 0x240   : > { %v1598_v54 = vmul.f32 %v1582_v3, %v3941_v15  ;;  %v1567_v52 = vmul.f32 %v1551_v18, %v3915_v17  ;;  %v1542_v19 = vadd.f32 -1.4531521, %v1526_v60  ;;  %v1527_v4 = vmul.f32 1.0614054, %v3909_v8 }
 0x241   : > { %v1884_v59 = vsel %vm1847_vm15, %v1843_v44, 0.0  ;;  %v1771_v6 = vmul.f32 %v1755_v35, %v4507_v22  ;;  %v1636_v10 = vadd.f32 0.2548296, %v1620_v1  ;;  %v1645_v25 = vadd.f32 0.2548296, %v1629_v27 }
 0x242   : > { %1885 = vadd.xlane.f32.xlu0 %v1884_v59  ;;  %v1614_v21 = vadd.f32 -0.28449672, %v1598_v54  ;;  %v1583_v13 = vadd.f32 1.4214138, %v1567_v52  ;;  %v1558_v55 = vmul.f32 %v1542_v19, %v3943_v7  ;;  %v1543_v51 = vadd.f32 -1.4531521, %v1527_v4 }
 0x243   : > { %v1803_v29 = vadd.f32 1.0, %v1771_v6  ;;  %v1652_v0 = vmul.f32 %v1636_v10, %v3905_v11  ;;  %v1661_v26 = vmul.f32 %v1645_v25, %v3856_v37  ;;  %v1528_v9 = vmul.f32 1.0614054, %v4021_v20  ;;  %v4513_v59 = vld [vmem:[#allocation17_spill] sm:$0xff] }
 0x244   : > { %v1630_v32 = vmul.f32 %v1614_v21, %v3941_v15  ;;  %v1599_v61 = vmul.f32 %v1583_v13, %v3915_v17  ;;  %v1574_v28 = vadd.f32 1.4214138, %v1558_v55  ;;  %v1559_v23 = vmul.f32 %v1543_v51, %v3909_v8  ;;  %v4514_v6 = vld [vmem:[#allocation13_spill] sm:$0xff]  ;;  %v4515_v13 = vld [vmem:[#allocation28_spill] sm:$0xff]  ;;  %v4516_v51 = vld [vmem:[#allocation30_spill] sm:$0xff] }
 0x245   : > { %v1819_v45 = vmul.f32 %v1803_v29, %v4508_v24  ;;  %v1732_v47 = vmul.f32 %v3891_v57, %v1652_v0  ;;  %v1741_v30 = vmul.f32 %v3829_v16, %v1661_v26  ;;  %v1544_v46 = vadd.f32 -1.4531521, %v1528_v9 }
 0x246   : > { %v1646_v34 = vadd.f32 0.2548296, %v1630_v32  ;;  %v1615_v11 = vadd.f32 -0.28449672, %v1599_v61  ;;  %v1590_v37 = vmul.f32 %v1574_v28, %v3943_v7  ;;  %v1575_v33 = vadd.f32 1.4214138, %v1559_v23 }
 0x247   : > { %v1842_v42 = vmul.f32 %v3963_v63, %v1819_v45  ;;  %v1748_v41 = vsub.f32 1.0, %v1732_v47  ;;  %v1757_v14 = vsub.f32 1.0, %v1741_v30  ;;  %v1560_v40 = vmul.f32 %v1544_v46, %v4021_v20 }
 0x248   : > { %vm1383_vm0 = vcmp.lt.f32.partialorder %v3838_v48, 0.0  ;;  %vm1382_vm1 = vcmp.lt.f32.partialorder %v4509_v12, 0.0  ;;  %v1662_v57 = vmul.f32 %v1646_v34, %v3941_v15  ;;  %v1631_v16 = vmul.f32 %v1615_v11, %v3915_v17  ;;  %v4517_v34 = vld [vmem:[#allocation24_spill] sm:$0xff]  ;;  %v4523_v12 = vld [vmem:[#allocation22_spill] sm:$0xff] }
 0x249   : > { %v1606_v38 = vadd.f32 -0.28449672, %v1590_v37  ;;  %v1591_v31 = vmul.f32 %v1575_v33, %v3909_v8  ;;  %v1881_v53 = vsel %vm1847_vm15, %v1842_v42, 0.0  ;;  %v1764_v39 = vmul.f32 %v1748_v41, %v4510_v43  ;;  %v4518_v37 = vld [vmem:[#allocation25_spill] sm:$0xff] }
 0x24a   : > { %v1773_v5 = vmul.f32 %v1757_v14, %v4511_v36  ;;  %v1576_v2 = vadd.f32 1.4214138, %v1560_v40  ;;  %1882 = vadd.xlane.f32.xlu1 %v1881_v53  ;;  %v1742_v3 = vmul.f32 %v4512_v62, %v1662_v57  ;;  %v1647_v18 = vadd.f32 0.2548296, %v1631_v16  ;;  %v4519_v41 = vld [vmem:[#allocation29_spill] sm:$0xff] }
 0x24b   : > { %v1622_v60 = vmul.f32 %v1606_v38, %v3943_v7  ;;  %v1607_v44 = vadd.f32 -0.28449672, %v1591_v31  ;;  %v1796_v15 = vadd.f32 1.0, %v1764_v39  ;;  %v1529_v27 = vmul.f32 1.0614054, %v3948_v49  ;;  %v4521_v39 = vld [vmem:[#allocation20_spill] sm:$0xff] }
 0x24c   : > { %v1805_v35 = vadd.f32 1.0, %v1773_v5  ;;  %v1592_v1 = vmul.f32 %v1576_v2, %v4021_v20  ;;  %v1758_v54 = vsub.f32 1.0, %v1742_v3  ;;  %v1663_v52 = vmul.f32 %v1647_v18, %v3915_v17  ;;  %v4522_v5 = vld [vmem:[#allocation27_spill] sm:$0xff] }
 0x24d   : > { %v1638_v19 = vadd.f32 0.2548296, %v1622_v60  ;;  %v1623_v4 = vmul.f32 %v1607_v44, %v3909_v8  ;;  %v1812_v22 = vmul.f32 %v1796_v15, %v4513_v59  ;;  %v1545_v21 = vadd.f32 -1.4531521, %v1529_v27  ;;  %v4524_v60 = vld [vmem:[#allocation16_spill] sm:$0xff] }
 0x24e   : > { %v1821_v10 = vmul.f32 %v1805_v35, %v4514_v6  ;;  %v1608_v25 = vadd.f32 -0.28449672, %v1592_v1  ;;  %v1774_v55 = vmul.f32 %v1758_v54, %v4515_v13  ;;  %v1743_v29 = vmul.f32 %v4516_v51, %v1663_v52  ;;  %v4525_v6 = vld [vmem:[#allocation26_spill] sm:$0xff]  ;;  %v4526_v51 = vld [vmem:[#allocation23_spill] sm:$0xff] }
 0x24f   : > { %v1654_v0 = vmul.f32 %v1638_v19, %v3943_v7  ;;  %v1639_v26 = vadd.f32 0.2548296, %v1623_v4  ;;  %v1835_v9 = vmul.f32 %v3963_v63, %v1812_v22  ;;  %v1561_v61 = vmul.f32 %v1545_v21, %v3948_v49 }
 0x250   : > { %v1844_v17 = vmul.f32 %v3963_v63, %v1821_v10  ;;  %v1624_v32 = vmul.f32 %v1608_v25, %v4021_v20  ;;  %v1806_v28 = vadd.f32 1.0, %v1774_v55  ;;  %v1759_v23 = vsub.f32 1.0, %v1743_v29 }
 0x251   : > { %v1734_v24 = vmul.f32 %v3930_v56, %v1654_v0  ;;  %v1655_v45 = vmul.f32 %v1639_v26, %v3909_v8  ;;  %v1860_v47 = vsel %vm1847_vm15, %v1835_v9, 0.0  ;;  %v1577_v46 = vadd.f32 1.4214138, %v1561_v61 }
 0x252   : > { %v1887_v30 = vsel %vm1847_vm15, %v1844_v17, 0.0  ;;  %v1640_v7 = vadd.f32 0.2548296, %v1624_v32  ;;  %1861 = vadd.xlane.f32.xlu0 %v1860_v47  ;;  %v1822_v11 = vmul.f32 %v1806_v28, %v4517_v34  ;;  %v1775_v33 = vmul.f32 %v1759_v23, %v4518_v37  ;;  %v4527_v28 = vld [vmem:[#allocation19_spill] sm:$0xff] }
 0x253   : > { %1888 = vadd.xlane.f32.xlu1 %v1887_v30  ;;  %v1750_v42 = vsub.f32 1.0, %v1734_v24  ;;  %v1735_v14 = vmul.f32 %v4519_v41, %v1655_v45  ;;  %v4520_v40 = vmov 1.0   ;;  %v1593_v16 = vmul.f32 %v1577_v46, %v3948_v49  ;;  %v4528_v30 = vld [vmem:[#allocation3_spill] sm:$0xff] }
 0x254   : > { %v1399_v56 = vsel %vm1383_vm0, -1.0, %v4520_v40  ;;  %v1398_v8 = vsel %vm1382_vm1, -1.0, %v4520_v40  ;;  %v1656_v57 = vmul.f32 %v1640_v7, %v4021_v20  ;;  %v1845_v38 = vmul.f32 %v3963_v63, %v1822_v11  ;;  %v3314_v46 = vld [vmem:[%s3511_s0] sm:$0xff]  ;;  %v1978_v11 = vpop.permute.xlu1 %1977  ;;  %s3012_s0 = sshll.u32 %s4549_s30, 1 }
 0x255   : > { %v1807_v31 = vadd.f32 1.0, %v1775_v33  ;;  %v1766_v53 = vmul.f32 %v1750_v42, %v1398_v8  ;;  %v1751_v43 = vsub.f32 1.0, %v1735_v14  ;;  %v1782_v36 = vmul.f32 0.5, %v4521_v39  ;;  %s676_s25 = sadd.s32 %s3012_s0, %s3479_s22 }
 0x256   : > { %vm1384_vm3 = vcmp.lt.f32.partialorder %v4522_v5, 0.0  ;;  %v1736_v48 = vmul.f32 %v3971_v50, %v1656_v57  ;;  %v1609_v2 = vadd.f32 -0.28449672, %v1593_v16  ;;  %v1890_v62 = vsel %vm1847_vm15, %v1845_v38, 0.0  ;;  %s3013_s20 = sshll.u32 %s676_s25, 3 }
 0x257   : > { %v1823_v3 = vmul.f32 %v1807_v31, %v4523_v12  ;;  %v1798_v18 = vadd.f32 1.0, %v1766_v53  ;;  %v1767_v20 = vmul.f32 %v1751_v43, %v1399_v56  ;;  %v1783_v44 = vmul.f32 0.5, %v4524_v60  ;;  %1891 = vadd.xlane.f32.xlu0 %v1890_v62  ;;  %s678_s24 = scalar_lea.vmem %s4441_s14, %s3013_s20 }
 0x258   : > { %v1752_v15 = vsub.f32 1.0, %v1736_v48  ;;  %v1625_v35 = vmul.f32 %v1609_v2, %v3948_v49  ;;  %v1400_v1 = vsel %vm1384_vm3, -1.0, %v4520_v40  ;;  %v1784_v10 = vmul.f32 0.5, %v4525_v6  ;;  %v1982_v37 = vpop.permute.xlu1 %1981 }
 0x259   : > { %v1846_v27 = vmul.f32 %v3963_v63, %v1823_v3  ;;  %v1814_v54 = vmul.f32 %v1798_v18, %v1782_v36  ;;  %v1799_v52 = vadd.f32 1.0, %v1767_v20  ;;  %vm1385_vm4 = vcmp.lt.f32.partialorder %v4526_v51, 0.0 }
 0x25a   : > { %v1768_v50 = vmul.f32 %v1752_v15, %v1400_v1  ;;  %v1641_v19 = vadd.f32 0.2548296, %v1625_v35  ;;  %v1401_v32 = vsel %vm1385_vm4, -1.0, %v4520_v40  ;;  %v1785_v23 = vmul.f32 0.5, %v4527_v28 }
 0x25b   : > { %v1893_v4 = vsel %vm1847_vm15, %v1846_v27, 0.0  ;;  %v1837_v59 = vmul.f32 %v3963_v63, %v1814_v54  ;;  %v1815_v22 = vmul.f32 %v1799_v52, %v1783_v44  ;;  %v4109_v7 = vsub.s32 7, %v4528_v30 }
 0x25c   : > { %1894 = vadd.xlane.f32.xlu1 %v1893_v4  ;;  %v1800_v25 = vadd.f32 1.0, %v1768_v50  ;;  %v1657_v21 = vmul.f32 %v1641_v19, %v3948_v49  ;;  %v1989_v33 = vpop.permute.xlu1 %1988 }
 0x25d   : > { %v1866_v13 = vsel %vm1847_vm15, %v1837_v59, 0.0  ;;  %v1838_v55 = vmul.f32 %v3963_v63, %v1815_v22  ;;  %v2052_v34 = vrot.slane %v3314_v46, %v4109_v7 }
 0x25e   : > { %1867 = vadd.xlane.f32.xlu0 %v1866_v13  ;;  %v1816_v29 = vmul.f32 %v1800_v25, %v1784_v10  ;;  %v1737_v0 = vmul.f32 %v3935_v58, %v1657_v21 }
 0x25f   : > { %v1869_v26 = vsel %vm1847_vm15, %v1838_v55, 0.0 }
 0x260   : > { %1870 = vadd.xlane.f32.xlu1 %v1869_v26  ;;  %v1839_v9 = vmul.f32 %v3963_v63, %v1816_v29  ;;  %v1753_v17 = vsub.f32 1.0, %v1737_v0  ;;  %v1993_v42 = vpop.permute.xlu1 %1992 }
 0x262   : > { %v1872_v49 = vsel %vm1847_vm15, %v1839_v9, 0.0  ;;  %v1769_v61 = vmul.f32 %v1753_v17, %v1401_v32 }
 0x263   : > { %1873 = vadd.xlane.f32.xlu0 %v1872_v49 }
 0x264   : > { %v1801_v24 = vadd.f32 1.0, %v1769_v61  ;;  %v4113_v41 = vpop.permute.xlu1 %1999 }
 0x266   : > { %v1817_v45 = vmul.f32 %v1801_v24, %v1785_v23 }
 0x268   : > { %v1840_v47 = vmul.f32 %v3963_v63, %v1817_v45  ;;  %v2004_v14 = vpop.permute.xlu1 %2003  ;;  %v4117_v63 = vpop.permute.xlu0 %1903 }
 0x26a   : > { %v1875_v58 = vsel %vm1847_vm15, %v1840_v47, 0.0 }
 0x26b   : > { %1876 = vadd.xlane.f32.xlu1 %v1875_v58 }
 0x26c   : > { %v4115_v40 = vpop.permute.xlu1 %2010  ;;  %v4121_v8 = vpop.permute.xlu0 %2021 }
 0x270   : > { %v4119_v56 = vpop.permute.xlu1 %2014  ;;  %v2033_v16 = vpop.permute.xlu0 %2032 }
 0x274   : > { %v4123_v57 = vpop.permute.xlu1 %2025  ;;  %v2044_v31 = vpop.permute.xlu0 %2043 }
 0x278   : > { %v2037_v38 = vpop.permute.xlu1 %2036 }
 0x279   : > { %2054 = vbcast.lane.b32.xlu0 %v2052_v34, 256 }
 0x27c   : > { %2058 = vbcast.lane.b32.xlu1 %v2052_v34, 264  ;;  %v4125_v53 = vpop.permute.xlu1 %2047 }
 0x2bd   : > { %v1850_v43 = vpop.xlane.xlu0 %1849 }
 0x2be   : > { %v1906_v39 = vadd.f32 %v4117_v63, %v1850_v43 }
 0x2c0   : > { %v1856_v36 = vpop.xlane.xlu1 %1855  ;;  %vm1922_vm5 = vcmp.gt.f32.partialorder %v1906_v39, 0.0  ;;  %v1938_v5 = vmul.f32 0.2, %v1906_v39 }
 0x2c1   : > { %v1908_v48 = vadd.f32 %v4117_v63, %v1856_v36 }
 0x2c2   : > { %v1954_v62 = vsel %vm1922_vm5, %v1906_v39, %v1938_v5 }
 0x2c3   : > { %vm1924_vm6 = vcmp.gt.f32.partialorder %v1908_v48, 0.0  ;;  %v1940_v2 = vmul.f32 0.2, %v1908_v48  ;;  %v4129_v12 = vadd.f32 %v1978_v11, %v1954_v62 }
 0x2c4   : > { %v1853_v3 = vpop.xlane.xlu0 %1852 }
 0x2c5   : > { %v1956_v18 = vsel %vm1924_vm6, %v1908_v48, %v1940_v2  ;;  %v1907_v20 = vadd.f32 %v4117_v63, %v1853_v3  ;;  %2109 = vperm.xlu0 %3212, %v4129_v12   ;;  %vm2167_vm6 = vcmask 130112  }
 0x2c6   : > { %v4133_v44 = vadd.f32 %v1989_v33, %v1956_v18 }
 0x2c7   : > { %vm1923_vm7 = vcmp.gt.f32.partialorder %v1907_v20, 0.0  ;;  %v1939_v60 = vmul.f32 0.2, %v1907_v20 }
 0x2c8   : > { %v1859_v15 = vpop.xlane.xlu1 %1858 }
 0x2c9   : > { %v1909_v35 = vadd.f32 %v4117_v63, %v1859_v15  ;;  %v1955_v1 = vsel %vm1923_vm7, %v1907_v20, %v1939_v60  ;;  %2115 = vperm.xlu0 %3212, %v4133_v44   ;;  %vm2232_vm7 = vcmask 1041409  }
 0x2ca   : > { %v1880_v27 = vpop.xlane.xlu0 %1879  ;;  %v4137_v54 = vadd.f32 %v1982_v37, %v1955_v1 }
 0x2cb   : > { %vm1925_vm8 = vcmp.gt.f32.partialorder %v1909_v35, 0.0  ;;  %v1941_v52 = vmul.f32 0.2, %v1909_v35  ;;  %v1916_v50 = vadd.f32 %v4117_v63, %v1880_v27 }
 0x2cc   : > { %v1865_v19 = vpop.xlane.xlu1 %1864  ;;  %2112 = vperm.xlu1 %3213, %v4137_v54  }
 0x2cd   : > { %vm1932_vm9 = vcmp.gt.f32.partialorder %v1916_v50, 0.0  ;;  %v1948_v4 = vmul.f32 0.2, %v1916_v50  ;;  %v1911_v59 = vadd.f32 %v4117_v63, %v1865_v19  ;;  %v1957_v22 = vsel %vm1925_vm8, %v1909_v35, %v1941_v52 }
 0x2ce   : > { %v4142_v6 = vadd.f32 %v1993_v42, %v1957_v22  ;;  %vm2234_vm8 = vcmask 1042434  }
 0x2cf   : > { %vm1927_vm10 = vcmp.gt.f32.partialorder %v1911_v59, 0.0  ;;  %v1943_v10 = vmul.f32 0.2, %v1911_v59  ;;  %v1886_v25 = vpop.xlane.xlu0 %1885  ;;  %v1964_v21 = vsel %vm1932_vm9, %v1916_v50, %v1948_v4  ;;  %vm2236_vm9 = vcmask 1043459  }
 0x2d0   : > { %v1918_v13 = vadd.f32 %v4117_v63, %v1886_v25  ;;  %2118 = vperm.xlu1 %3213, %v4142_v6   ;;  %v4146_v55 = vadd.f32 %v2033_v16, %v1964_v21 }
 0x2d1   : > { %v1959_v51 = vsel %vm1927_vm10, %v1911_v59, %v1943_v10  ;;  %vm2238_vm10 = vcmask 1044484  }
 0x2d2   : > { %vm1934_vm11 = vcmp.gt.f32.partialorder %v1918_v13, 0.0  ;;  %v1950_v29 = vmul.f32 0.2, %v1918_v13  ;;  %2139 = vperm.xlu0 %3212, %v4146_v55   ;;  %v4149_v0 = vadd.f32 %v2004_v14, %v1959_v51 }
 0x2d4   : > { %2124 = vperm.xlu1 %3213, %v4149_v0   ;;  %v1966_v26 = vsel %vm1934_vm11, %v1918_v13, %v1950_v29  ;;  %vm2240_vm11 = vcmask 1045509  }
 0x2d5   : > { %v4152_v9 = vadd.f32 %v2044_v31, %v1966_v26 }
 0x2d7   : > { %v1883_v17 = vpop.xlane.xlu1 %1882  ;;  %2145 = vperm.xlu0 %3212, %v4152_v9  }
 0x2d8   : > { %v1917_v32 = vadd.f32 %v4117_v63, %v1883_v17 }
 0x2da   : > { %vm1933_vm12 = vcmp.gt.f32.partialorder %v1917_v32, 0.0  ;;  %v1949_v49 = vmul.f32 0.2, %v1917_v32 }
 0x2dc   : > { %v1965_v61 = vsel %vm1933_vm12, %v1917_v32, %v1949_v49  ;;  %v4529_v32 = vlaneseq  ;;  %vm2242_vm12 = vcmask 1046534  }
 0x2dd   : > { %v4156_v28 = vadd.f32 %v2037_v38, %v1965_v61 }
 0x2de   : > { %v2157_v49 = vand.u32 127, %v4529_v32 }
 0x2df   : > { %v1862_v23 = vpop.xlane.xlu0 %1861  ;;  %2142 = vperm.xlu1 %3213, %v4156_v28  }
 0x2e0   : > { %v1889_v24 = vpop.xlane.xlu1 %1888  ;;  %v1910_v45 = vadd.f32 %v4117_v63, %v1862_v23  ;;  %v2162_v61 = vadd.s32 4294967288, %v2157_v49 }
 0x2e1   : > { %v1919_v47 = vadd.f32 %v4117_v63, %v1889_v24 }
 0x2e2   : > { %vm1926_vm13 = vcmp.gt.f32.partialorder %v1910_v45, 0.0  ;;  %v1942_v58 = vmul.f32 0.2, %v1910_v45 }
 0x2e3   : > { %vm1935_vm14 = vcmp.gt.f32.partialorder %v1919_v47, 0.0  ;;  %v1951_v46 = vmul.f32 0.2, %v1919_v47 }
 0x2e4   : > { %v1892_v34 = vpop.xlane.xlu0 %1891  ;;  %v1958_v11 = vsel %vm1926_vm13, %v1910_v45, %v1942_v58  ;;  %v4199_v45 = vsub.s32 %v2162_v61, %v4528_v30  ;;  %vm2244_vm13 = vcmask 1047559  }
 0x2e5   : > { %v1967_v37 = vsel %vm1935_vm14, %v1919_v47, %v1951_v46  ;;  %v4162_v33 = vadd.f32 %v4113_v41, %v1958_v11  ;;  %v4202_v47 = vsub.s32 %v2157_v49, %v4528_v30  ;;  %vm2247_vm14 = vcmask 130048  }
 0x2e6   : > { %v4165_v42 = vadd.f32 %v4125_v53, %v1967_v37  ;;  %v1920_v53 = vadd.f32 %v4117_v63, %v1892_v34 }
 0x2e7   : > { %2121 = vperm.xlu0 %3212, %v4162_v33  }
 0x2e8   : > { %2148 = vperm.xlu1 %3213, %v4165_v42   ;;  %v1952_v20 = vmul.f32 0.2, %v1920_v53  ;;  %vm1936_vm3 = vcmp.gt.f32.partialorder %v1920_v53, 0.0 }
 0x2e9   : > { %v1895_v14 = vpop.xlane.xlu1 %1894 }
 0x2ea   : > { %v1968_v52 = vsel %vm1936_vm3, %v1920_v53, %v1952_v20 }
 0x2eb   : > { %v1868_v16 = vpop.xlane.xlu0 %1867 }
 0x2ec   : > { %v1912_v38 = vadd.f32 %v4117_v63, %v1868_v16 }
 0x2ed   : > { %v1871_v31 = vpop.xlane.xlu1 %1870 }
 0x2ee   : > { %vm1928_vm15 = vcmp.gt.f32.partialorder %v1912_v38, 0.0  ;;  %v1944_v43 = vmul.f32 0.2, %v1912_v38  ;;  %v1913_v39 = vadd.f32 %v4117_v63, %v1871_v31 }
 0x2f0   : > { %vm1929_vm0 = vcmp.gt.f32.partialorder %v1913_v39, 0.0  ;;  %v1945_v36 = vmul.f32 0.2, %v1913_v39  ;;  %v1874_v41 = vpop.xlane.xlu0 %1873  ;;  %v1960_v5 = vsel %vm1928_vm15, %v1912_v38, %v1944_v43 }
 0x2f1   : > { %v1914_v48 = vadd.f32 %v4117_v63, %v1874_v41  ;;  %v4174_v2 = vadd.f32 %v4115_v40, %v1960_v5  ;;  %v1921_v40 = vadd.f32 %v4117_v63, %v1895_v14 }
 0x2f2   : > { %v1961_v62 = vsel %vm1929_vm0, %v1913_v39, %v1945_v36 }
 0x2f3   : > { %vm1930_vm1 = vcmp.gt.f32.partialorder %v1914_v48, 0.0  ;;  %v1946_v3 = vmul.f32 0.2, %v1914_v48  ;;  %2127 = vperm.xlu0 %3212, %v4174_v2   ;;  %v4178_v18 = vadd.f32 %v4119_v56, %v1961_v62  ;;  %v1953_v19 = vmul.f32 0.2, %v1921_v40 }
 0x2f4   : > { %v2055_v35 = vpop.permute.xlu0 %2054  ;;  %vm1937_vm5 = vcmp.gt.f32.partialorder %v1921_v40, 0.0 }
 0x2f5   : > { %2130 = vperm.xlu1 %3213, %v4178_v18   ;;  %v1962_v60 = vsel %vm1930_vm1, %v1914_v48, %v1946_v3  ;;  %v4187_v50 = vadd.f32 %v2055_v35, %v1968_v52  ;;  %v1969_v22 = vsel %vm1937_vm5, %v1921_v40, %v1953_v19 }
 0x2f6   : > { %v4182_v15 = vadd.f32 %v4121_v8, %v1962_v60 }
 0x2f8   : > { %v1877_v1 = vpop.xlane.xlu1 %1876  ;;  %2133 = vperm.xlu0 %3212, %v4182_v15  }
 0x2f9   : > { %v1915_v27 = vadd.f32 %v4117_v63, %v1877_v1 }
 0x2fb   : > { %vm1931_vm4 = vcmp.gt.f32.partialorder %v1915_v27, 0.0  ;;  %v1947_v56 = vmul.f32 0.2, %v1915_v27 }
 0x2fc   : > { %2151 = vperm.xlu0 %3212, %v4187_v50   ;;  %v2059_v59 = vpop.permute.xlu1 %2058 }
 0x2fd   : > { %v1963_v4 = vsel %vm1931_vm4, %v1915_v27, %v1947_v56  ;;  %v4194_v10 = vadd.f32 %v2059_v59, %v1969_v22 }
 0x2fe   : > { %v4191_v8 = vadd.f32 %v4123_v57, %v1963_v4 }
 0x300   : > { %2136 = vperm.xlu1 %3213, %v4191_v8  }
 0x304   : > { %2154 = vperm.xlu1 %3213, %v4194_v10  }
 0x344   : > { %v2110_v63 = vpop.permute.xlu0 %2109 }
 0x345   : > { %v2161_v31 = vrot.slane %v2110_v63, %v4202_v47 }
 0x348   : > { %v2116_v21 = vpop.permute.xlu0 %2115 }
 0x349   : > { %v2172_v37 = vrot.slane %v2116_v21, %v4202_v47 }
 0x34b   : > { %v2113_v25 = vpop.permute.xlu1 %2112 }
 0x34c   : > { %v2166_v11 = vrot.slane %v2113_v25, %v4199_v45 }
 0x34e   : > { %v2168_v36 = vsel %vm2167_vm6, %v2166_v11, %v2161_v31 }
 0x34f   : > { %v2119_v13 = vpop.permute.xlu1 %2118 }
 0x350   : > { %v2176_v46 = vrot.slane %v2119_v13, %v4199_v45 }
 0x351   : > { %v2140_v51 = vpop.permute.xlu0 %2139 }
 0x352   : > { %v2177_v30 = vsel %vm2167_vm6, %v2176_v46, %v2172_v37  ;;  %v2208_v60 = vrot.slane %v2140_v51, %v4202_v47 }
 0x353   : > { %v2125_v29 = vpop.permute.xlu1 %2124  ;;  %v2233_v48 = vsel %vm2232_vm7, %v2177_v30, %v2168_v36  ;;  %v4534_v36 = vld [vmem:[#allocation7_spill] sm:$0xff] }
 0x354   : > { %v2185_v38 = vrot.slane %v2125_v29, %v4199_v45 }
 0x356   : > { %v2146_v26 = vpop.permute.xlu0 %2145 }
 0x357   : > { %v2217_v40 = vrot.slane %v2146_v26, %v4202_v47 }
 0x35e   : > { %v2143_v17 = vpop.permute.xlu1 %2142 }
 0x35f   : > { %v2212_v41 = vrot.slane %v2143_v17, %v4199_v45  ;;  %v4530_v17 = vld [vmem:[#allocation4_spill] sm:$0xff] }
 0x361   : > { %v2213_v56 = vsel %vm2167_vm6, %v2212_v41, %v2208_v60 }
 0x366   : > { %v2122_v57 = vpop.permute.xlu0 %2121 }
 0x367   : > { %v2149_v23 = vpop.permute.xlu1 %2148  ;;  %v2181_v34 = vrot.slane %v2122_v57, %v4202_v47  ;;  %v4531_v57 = vld [vmem:[#allocation5_spill] sm:$0xff] }
 0x368   : > { %v2221_v62 = vrot.slane %v2149_v23, %v4199_v45  ;;  %v4532_v23 = vld [vmem:[#allocation8_spill] sm:$0xff] }
 0x369   : > { %v2186_v39 = vsel %vm2167_vm6, %v2185_v38, %v2181_v34  ;;  %v4533_v38 = vld [vmem:[#allocation6_spill] sm:$0xff] }
 0x36a   : > { %v2235_v35 = vsel %vm2234_vm8, %v2186_v39, %v2233_v48  ;;  %v2222_v59 = vsel %vm2167_vm6, %v2221_v62, %v2217_v40 }
 0x372   : > { %v2128_v24 = vpop.permute.xlu0 %2127 }
 0x373   : > { %v2190_v43 = vrot.slane %v2128_v24, %v4202_v47 }
 0x374   : > { %v2131_v58 = vpop.permute.xlu1 %2130 }
 0x375   : > { %v2194_v14 = vrot.slane %v2131_v58, %v4199_v45 }
 0x377   : > { %v2134_v16 = vpop.permute.xlu0 %2133  ;;  %v2195_v5 = vsel %vm2167_vm6, %v2194_v14, %v2190_v43 }
 0x378   : > { %v2199_v3 = vrot.slane %v2134_v16, %v4202_v47  ;;  %v2237_v27 = vsel %vm2236_vm9, %v2195_v5, %v2235_v35 }
 0x37b   : > { %v2152_v1 = vpop.permute.xlu0 %2151 }
 0x37c   : > { %v2226_v22 = vrot.slane %v2152_v1, %v4202_v47 }
 0x37f   : > { %v2137_v53 = vpop.permute.xlu1 %2136 }
 0x380   : > { %v2203_v20 = vrot.slane %v2137_v53, %v4199_v45 }
 0x382   : > { %v2204_v52 = vsel %vm2167_vm6, %v2203_v20, %v2199_v3 }
 0x383   : > { %v2239_v19 = vsel %vm2238_vm10, %v2204_v52, %v2237_v27  ;;  %v2155_v4 = vpop.permute.xlu1 %2154 }
 0x384   : > { %v2230_v63 = vrot.slane %v2155_v4, %v4199_v45  ;;  %v2241_v25 = vsel %vm2240_vm11, %v2213_v56, %v2239_v19  ;;  %v4536_v19 = vld [vmem:[#allocation10_spill] sm:$0xff] }
 0x385   : > { %v2243_v21 = vsel %vm2242_vm12, %v2222_v59, %v2241_v25 }
 0x386   : > { %v2231_v13 = vsel %vm2167_vm6, %v2230_v63, %v2226_v22 }
 0x387   : > { %v2245_v51 = vsel %vm2244_vm13, %v2231_v13, %v2243_v21 }
 0x388   : > { %v2248_v29 = vsel %vm2247_vm14, %v2245_v51, -inf }
 0x389   : > { %2249 = vmax.xlane.f32.xlu0 %v2248_v29 }
 0x416   : > { %v2250_v26 = vpop.xlane.xlu0 %2249 }
 0x417   : > { %v2255_v32 = vrot.slane %v2250_v26, %v4530_v17  ;;  %v2259_v61 = vrot.slane %v2250_v26, %v4531_v57  ;;  %v2271_v24 = vrot.slane %v2250_v26, %v4532_v23  ;;  %v4244_v14 = vrot.slane %v2250_v26, %v4109_v7 }
 0x418   : > { %v2263_v31 = vrot.slane %v2250_v26, %v4533_v38  ;;  %v2267_v41 = vrot.slane %v2250_v26, %v4534_v36  ;;  %v2279_v4 = vrot.slane %v2250_v26, %v4536_v19 }
 0x419   : > { %v2292_v49 = vsub.f32 %v4129_v12, %v2255_v32  ;;  %v2293_v58 = vsub.f32 %v4137_v54, %v2255_v32  ;;  %v2294_v34 = vsub.f32 %v4133_v44, %v2259_v61  ;;  %v2300_v11 = vsub.f32 %v4182_v15, %v2271_v24 }
 0x41a   : > { %v2295_v12 = vsub.f32 %v4142_v6, %v2259_v61  ;;  %v2306_v54 = vsub.f32 %v4187_v50, %v4244_v14  ;;  %v2296_v44 = vsub.f32 %v4162_v33, %v2263_v31  ;;  %v2297_v5 = vsub.f32 %v4149_v0, %v2263_v31 }
 0x41b   : > { %v2308_v46 = vmul.f32 1.442695, %v2292_v49  ;;  %v2310_v37 = vmul.f32 1.442695, %v2293_v58  ;;  %v2312_v16 = vmul.f32 1.442695, %v2294_v34  ;;  %v2298_v33 = vsub.f32 %v4174_v2, %v2267_v41 }
 0x41c   : > { %v2324_v30 = vmul.f32 1.442695, %v2300_v11  ;;  %v2314_v43 = vmul.f32 1.442695, %v2295_v12  ;;  %v2336_v39 = vmul.f32 1.442695, %v2306_v54  ;;  %v2299_v0 = vsub.f32 %v4178_v18, %v2267_v41 }
 0x41d   : > { %3278 = vpow2.f32 %v2308_v46  ;;  %v2316_v6 = vmul.f32 1.442695, %v2296_v44  ;;  %v2318_v50 = vmul.f32 1.442695, %v2297_v5  ;;  %v2320_v3 = vmul.f32 1.442695, %v2298_v33 }
 0x41e   : > { %3280 = vpow2.f32 %v2310_v37  ;;  %v4535_v2 = vld [vmem:[#allocation9_spill] sm:$0xff]  ;;  %v2301_v1 = vsub.f32 %v4191_v8, %v2271_v24  ;;  %v2322_v40 = vmul.f32 1.442695, %v2299_v0  ;;  %v2304_v63 = vsub.f32 %v4152_v9, %v2279_v4 }
 0x41f   : > { %3282 = vpow2.f32 %v2312_v16  ;;  %v2275_v35 = vrot.slane %v2250_v26, %v4535_v2  ;;  %v2305_v21 = vsub.f32 %v4165_v42, %v2279_v4 }
 0x420   : > { %3284 = vpow2.f32 %v2324_v30  ;;  %v2326_v52 = vmul.f32 1.442695, %v2301_v1  ;;  %v2332_v13 = vmul.f32 1.442695, %v2304_v63 }
 0x421   : > { %3286 = vpow2.f32 %v2314_v43  ;;  %v2302_v18 = vsub.f32 %v4146_v55, %v2275_v35  ;;  %v2303_v8 = vsub.f32 %v4156_v28, %v2275_v35  ;;  %v2307_v28 = vsub.f32 %v4194_v10, %v4244_v14 }
 0x422   : > { %3288 = vpow2.f32 %v2336_v39  ;;  %v2334_v29 = vmul.f32 1.442695, %v2305_v21 }
 0x423   : > { %3290 = vpow2.f32 %v2316_v6  ;;  %v2328_v59 = vmul.f32 1.442695, %v2302_v18  ;;  %v2330_v55 = vmul.f32 1.442695, %v2303_v8  ;;  %v2338_v26 = vmul.f32 1.442695, %v2307_v28 }
 0x424   : > { %3292 = vpow2.f32 %v2318_v50 }
 0x425   : > { %3294 = vpow2.f32 %v2320_v3 }
 0x426   : > { %3296 = vpow2.f32 %v2322_v40 }
 0x427   : > { %v4251_v15 = vpop.eup %3278  ;;  %3298 = vpow2.f32 %v2326_v52 }
 0x428   : > { %2357 = vperm.xlu1 %3213, %v4251_v15   ;;  %v4256_v53 = vpop.eup %3280  ;;  %3300 = vpow2.f32 %v2328_v59 }
 0x429   : > { %v4260_v48 = vpop.eup %3282  ;;  %3302 = vpow2.f32 %v2330_v55 }
 0x42a   : > { %v4262_v62 = vpop.eup %3284  ;;  %3304 = vpow2.f32 %v2332_v13 }
 0x42b   : > { %2381 = vperm.xlu0 %3212, %v4262_v62   ;;  %v4267_v20 = vpop.eup %3286  ;;  %3306 = vpow2.f32 %v2334_v29 }
 0x42c   : > { %2360 = vperm.xlu1 %3213, %v4256_v53   ;;  %v4270_v60 = vpop.eup %3288  ;;  %3308 = vpow2.f32 %v2338_v26 }
 0x42d   : > { %v4275_v27 = vpop.eup %3290 }
 0x42e   : > { %v4279_v56 = vpop.eup %3292 }
 0x42f   : > { %2399 = vperm.xlu0 %3212, %v4270_v60   ;;  %v4284_v22 = vpop.eup %3294 }
 0x430   : > { %2363 = vperm.xlu1 %3213, %v4260_v48   ;;  %v4288_v25 = vpop.eup %3296 }
 0x431   : > { %v4292_v51 = vpop.eup %3298 }
 0x432   : > { %v4297_v9 = vpop.eup %3300 }
 0x433   : > { %v4300_v32 = vpop.eup %3302 }
 0x434   : > { %2366 = vperm.xlu1 %3213, %v4267_v20   ;;  %v4303_v42 = vpop.eup %3304 }
 0x435   : > { %v4306_v49 = vpop.eup %3306 }
 0x436   : > { %v3309_v10 = vpop.eup %3308 }
 0x438   : > { %2369 = vperm.xlu1 %3213, %v4275_v27  }
 0x43c   : > { %2372 = vperm.xlu1 %3213, %v4279_v56  }
 0x440   : > { %2375 = vperm.xlu1 %3213, %v4284_v22  }
 0x444   : > { %2378 = vperm.xlu1 %3213, %v4288_v25  }
 0x448   : > { %2384 = vperm.xlu1 %3213, %v4292_v51  }
 0x44c   : > { %2387 = vperm.xlu1 %3213, %v4297_v9  }
 0x450   : > { %2390 = vperm.xlu1 %3213, %v4300_v32  }
 0x454   : > { %2393 = vperm.xlu1 %3213, %v4303_v42  }
 0x458   : > { %2396 = vperm.xlu1 %3213, %v4306_v49  }
 0x45c   : > { %2402 = vperm.xlu1 %3213, %v3309_v10  }
 0x4a7   : > { %v2358_v61 = vpop.permute.xlu1 %2357 }
 0x4a8   : > { %v2407_v50 = vrot.slane %v2358_v61, %v4202_v47 }
 0x4aa   : > { %v2382_v54 = vpop.permute.xlu0 %2381 }
 0x4ab   : > { %v2361_v24 = vpop.permute.xlu1 %2360  ;;  %v2443_v1 = vrot.slane %v2382_v54, %v4202_v47 }
 0x4ac   : > { %v2411_v39 = vrot.slane %v2361_v24, %v4199_v45 }
 0x4ae   : > { %v2412_v52 = vsel %vm2167_vm6, %v2411_v39, %v2407_v50  ;;  %v2400_v63 = vpop.permute.xlu0 %2399 }
 0x4af   : > { %v2364_v58 = vpop.permute.xlu1 %2363 }
 0x4b0   : > { %v2416_v41 = vrot.slane %v2364_v58, %v4202_v47  ;;  %v2470_v58 = vrot.slane %v2400_v63, %v4202_v47 }
 0x4b3   : > { %v2367_v46 = vpop.permute.xlu1 %2366 }
 0x4b4   : > { %v2420_v30 = vrot.slane %v2367_v46, %v4199_v45 }
 0x4b6   : > { %v2421_v0 = vsel %vm2167_vm6, %v2420_v30, %v2416_v41 }
 0x4b7   : > { %v2370_v34 = vpop.permute.xlu1 %2369  ;;  %v2476_v55 = vsel %vm2232_vm7, %v2421_v0, %v2412_v52 }
 0x4b8   : > { %v2425_v6 = vrot.slane %v2370_v34, %v4202_v47 }
 0x4bb   : > { %v2373_v11 = vpop.permute.xlu1 %2372 }
 0x4bc   : > { %v2429_v44 = vrot.slane %v2373_v11, %v4199_v45 }
 0x4be   : > { %v2430_v40 = vsel %vm2167_vm6, %v2429_v44, %v2425_v6 }
 0x4bf   : > { %v2376_v37 = vpop.permute.xlu1 %2375  ;;  %v2477_v28 = vsel %vm2234_vm8, %v2430_v40, %v2476_v55 }
 0x4c0   : > { %v2434_v3 = vrot.slane %v2376_v37, %v4202_v47 }
 0x4c3   : > { %v2379_v14 = vpop.permute.xlu1 %2378 }
 0x4c4   : > { %v2438_v5 = vrot.slane %v2379_v14, %v4199_v45 }
 0x4c6   : > { %v2439_v4 = vsel %vm2167_vm6, %v2438_v5, %v2434_v3 }
 0x4c7   : > { %v2385_v16 = vpop.permute.xlu1 %2384  ;;  %v2478_v26 = vsel %vm2236_vm9, %v2439_v4, %v2477_v28 }
 0x4c8   : > { %v2447_v33 = vrot.slane %v2385_v16, %v4199_v45 }
 0x4ca   : > { %v2448_v21 = vsel %vm2167_vm6, %v2447_v33, %v2443_v1 }
 0x4cb   : > { %v2388_v31 = vpop.permute.xlu1 %2387  ;;  %v2479_v46 = vsel %vm2238_vm10, %v2448_v21, %v2478_v26 }
 0x4cc   : > { %v2452_v8 = vrot.slane %v2388_v31, %v4202_v47 }
 0x4cf   : > { %v2391_v12 = vpop.permute.xlu1 %2390 }
 0x4d0   : > { %v2456_v35 = vrot.slane %v2391_v12, %v4199_v45 }
 0x4d2   : > { %v2457_v29 = vsel %vm2167_vm6, %v2456_v35, %v2452_v8 }
 0x4d3   : > { %v2394_v43 = vpop.permute.xlu1 %2393  ;;  %v2480_v11 = vsel %vm2240_vm11, %v2457_v29, %v2479_v46 }
 0x4d4   : > { %v2461_v13 = vrot.slane %v2394_v43, %v4202_v47 }
 0x4d7   : > { %v2397_v18 = vpop.permute.xlu1 %2396 }
 0x4d8   : > { %v2465_v59 = vrot.slane %v2397_v18, %v4199_v45 }
 0x4da   : > { %v2466_v61 = vsel %vm2167_vm6, %v2465_v59, %v2461_v13 }
 0x4db   : > { %v2403_v24 = vpop.permute.xlu1 %2402  ;;  %v2481_v14 = vsel %vm2242_vm12, %v2466_v61, %v2480_v11 }
 0x4dc   : > { %v2474_v34 = vrot.slane %v2403_v24, %v4199_v45 }
 0x4de   : > { %v2475_v37 = vsel %vm2167_vm6, %v2474_v34, %v2470_v58 }
 0x4df   : > { %v2482_v16 = vsel %vm2244_vm13, %v2475_v37, %v2481_v14 }
 0x4e0   : > { %v2484_v31 = vsel %vm2247_vm14, %v2482_v16, 0.0 }
 0x4e1   : > { %2485 = vadd.xlane.f32.xlu0 %v2484_v31 }
 0x56e   : > { %v2486_v12 = vpop.xlane.xlu0 %2485 }
 0x56f   : > { %3310 = vrcp.f32 %v2486_v12 }
 0x579   : > { %v3311_v30 = vpop.eup %3310 }
 0x57a   : > { %v2509_v54 = vrot.slane %v3311_v30, %v4532_v23  ;;  %v2493_v44 = vrot.slane %v3311_v30, %v4530_v17  ;;  %v2521_v41 = vrot.slane %v3311_v30, %v4109_v7  ;;  %v2497_v33 = vrot.slane %v3311_v30, %v4531_v57 }
 0x57b   : > { %v2501_v23 = vrot.slane %v3311_v30, %v4533_v38 }
 0x57c   : > { %v2538_v43 = vmul.f32 %v4262_v62, %v2509_v54  ;;  %v2530_v39 = vmul.f32 %v4251_v15, %v2493_v44  ;;  %v2545_v5 = vmul.f32 %v3309_v10, %v2521_v41  ;;  %v2531_v6 = vmul.f32 %v4256_v53, %v2493_v44 }
 0x57d   : > { %v2532_v50 = vmul.f32 %v4260_v48, %v2497_v33  ;;  %v2533_v17 = vmul.f32 %v4267_v20, %v2497_v33  ;;  %v2534_v15 = vmul.f32 %v4275_v27, %v2501_v23  ;;  %v2535_v7 = vmul.f32 %v4279_v56, %v2501_v23 }
 0x57e   : > { %2587 = vperm.xlu0 %3212, %v2538_v43   ;;  %2563 = vperm.xlu1 %3213, %v2530_v39   ;;  %v2505_v62 = vrot.slane %v3311_v30, %v4534_v36  ;;  %v2539_v48 = vmul.f32 %v4292_v51, %v2509_v54  ;;  %v2513_v20 = vrot.slane %v3311_v30, %v4535_v2 }
 0x57f   : > { %v2517_v56 = vrot.slane %v3311_v30, %v4536_v19 }
 0x580   : > { %v2536_v57 = vmul.f32 %v4284_v22, %v2505_v62  ;;  %v2537_v53 = vmul.f32 %v4288_v25, %v2505_v62  ;;  %v2540_v38 = vmul.f32 %v4297_v9, %v2513_v20  ;;  %v2541_v27 = vmul.f32 %v4300_v32, %v2513_v20 }
 0x581   : > { %v2542_v36 = vmul.f32 %v4303_v42, %v2517_v56  ;;  %v2543_v22 = vmul.f32 %v4306_v49, %v2517_v56  ;;  %v2544_v25 = vmul.f32 %v4270_v60, %v2521_v41 }
 0x582   : > { %2608 = vperm.xlu0 %3212, %v2545_v5   ;;  %2566 = vperm.xlu1 %3213, %v2531_v6  }
 0x586   : > { %2569 = vperm.xlu1 %3213, %v2532_v50  }
 0x58a   : > { %2572 = vperm.xlu1 %3213, %v2533_v17  }
 0x58e   : > { %2575 = vperm.xlu1 %3213, %v2534_v15  }
 0x592   : > { %2578 = vperm.xlu1 %3213, %v2535_v7  }
 0x596   : > { %2581 = vperm.xlu1 %3213, %v2536_v57  }
 0x59a   : > { %2584 = vperm.xlu1 %3213, %v2537_v53  }
 0x59e   : > { %2590 = vperm.xlu1 %3213, %v2539_v48  }
 0x5a2   : > { %2593 = vperm.xlu1 %3213, %v2540_v38  }
 0x5a6   : > { %2596 = vperm.xlu1 %3213, %v2541_v27   ;;  %v3041_v27 = vld [vmem:[%s667_s29] ss:$0 sm:$0xff] }
 0x5aa   : > { %2599 = vperm.xlu1 %3213, %v2542_v36   ;;  %v3042_v36 = vld [vmem:[%s670_s27] ss:$0 sm:$0xff] }
 0x5ae   : > { %2602 = vperm.xlu1 %3213, %v2543_v22  }
 0x5b2   : > { %2605 = vperm.xlu1 %3213, %v2544_v25  }
 0x5fd   : > { %v2564_v51 = vpop.permute.xlu1 %2563  ;;  %v2588_v18 = vpop.permute.xlu0 %2587 }
 0x5fe   : > { %v2613_v55 = vrot.slane %v2564_v51, %v4202_v47  ;;  %v2649_v29 = vrot.slane %v2588_v18, %v4202_v47 }
 0x601   : > { %v2567_v2 = vpop.permute.xlu1 %2566  ;;  %v2609_v11 = vpop.permute.xlu0 %2608 }
 0x602   : > { %v2617_v60 = vrot.slane %v2567_v2, %v4199_v45  ;;  %v2680_v43 = vrot.slane %v2609_v11, %v4199_v45 }
 0x604   : > { %v2618_v24 = vsel %vm2167_vm6, %v2617_v60, %v2613_v55 }
 0x605   : > { %v2570_v10 = vpop.permute.xlu1 %2569 }
 0x606   : > { %v2622_v4 = vrot.slane %v2570_v10, %v4202_v47 }
 0x609   : > { %v2573_v0 = vpop.permute.xlu1 %2572 }
 0x60a   : > { %v2626_v42 = vrot.slane %v2573_v0, %v4199_v45 }
 0x60c   : > { %v2627_v21 = vsel %vm2167_vm6, %v2626_v42, %v2622_v4 }
 0x60d   : > { %v2576_v9 = vpop.permute.xlu1 %2575  ;;  %v2682_v37 = vsel %vm2232_vm7, %v2627_v21, %v2618_v24 }
 0x60e   : > { %v2631_v59 = vrot.slane %v2576_v9, %v4202_v47 }
 0x611   : > { %v2579_v3 = vpop.permute.xlu1 %2578 }
 0x612   : > { %v2635_v49 = vrot.slane %v2579_v3, %v4199_v45 }
 0x614   : > { %v2636_v26 = vsel %vm2167_vm6, %v2635_v49, %v2631_v59 }
 0x615   : > { %v2582_v35 = vpop.permute.xlu1 %2581  ;;  %v2683_v31 = vsel %vm2234_vm8, %v2636_v26, %v2682_v37 }
 0x616   : > { %v2640_v13 = vrot.slane %v2582_v35, %v4202_v47 }
 0x619   : > { %v2585_v32 = vpop.permute.xlu1 %2584 }
 0x61a   : > { %v2644_v8 = vrot.slane %v2585_v32, %v4199_v45 }
 0x61c   : > { %v2645_v58 = vsel %vm2167_vm6, %v2644_v8, %v2640_v13 }
 0x61d   : > { %v2591_v1 = vpop.permute.xlu1 %2590  ;;  %v2684_v30 = vsel %vm2236_vm9, %v2645_v58, %v2683_v31 }
 0x61e   : > { %v2653_v63 = vrot.slane %v2591_v1, %v4199_v45 }
 0x620   : > { %v2654_v14 = vsel %vm2167_vm6, %v2653_v63, %v2649_v29 }
 0x621   : > { %v2594_v19 = vpop.permute.xlu1 %2593  ;;  %v2685_v39 = vsel %vm2238_vm10, %v2654_v14, %v2684_v30 }
 0x622   : > { %v2658_v46 = vrot.slane %v2594_v19, %v4202_v47 }
 0x625   : > { %v2597_v40 = vpop.permute.xlu1 %2596 }
 0x626   : > { %v2662_v28 = vrot.slane %v2597_v40, %v4199_v45 }
 0x628   : > { %v2663_v12 = vsel %vm2167_vm6, %v2662_v28, %v2658_v46 }
 0x629   : > { %v2600_v52 = vpop.permute.xlu1 %2599  ;;  %v2686_v5 = vsel %vm2240_vm11, %v2663_v12, %v2685_v39 }
 0x62a   : > { %v2667_v16 = vrot.slane %v2600_v52, %v4202_v47 }
 0x62d   : > { %v2603_v61 = vpop.permute.xlu1 %2602 }
 0x62e   : > { %v2671_v34 = vrot.slane %v2603_v61, %v4199_v45 }
 0x630   : > { %v2672_v54 = vsel %vm2167_vm6, %v2671_v34, %v2667_v16 }
 0x631   : > { %v2606_v44 = vpop.permute.xlu1 %2605  ;;  %v2687_v6 = vsel %vm2242_vm12, %v2672_v54, %v2686_v5 }
 0x632   : > { %v2676_v41 = vrot.slane %v2606_v44, %v4202_v47 }
 0x634   : > { %v2681_v33 = vsel %vm2167_vm6, %v2680_v43, %v2676_v41 }
 0x635   : > { %v2688_v50 = vsel %vm2244_vm13, %v2681_v33, %v2687_v6 }
 0x636   : > { %3145 = vmatmul.mubr.msk.f32.vlgmr.msra.gmra.mrb[10].mxu1 %vm2247_vm14, %v2688_v50 }
 0x709   : > { %v2757_v17 = vpop.f32.mrb[10].mxu1 }
 0x70a   : > { %v3146_v23 = vpop.f32.mrb[11].mxu1  ;;  %v2761_v45 = vsel %vm849_vm2, %v2757_v17, 0.0 }
 0x70b   : > { %2762 = vadd.xlane.f32.xlu1 %v2761_v45 }
 0x798   : > { %v2763_v47 = vpop.xlane.xlu1 %2762 }
 0x799   : > { %v2765_v15 = vmul.f32 0.125, %v2763_v47 }
 0x79b   : > { %v2766_v7 = vsub.f32 %v2757_v17, %v2765_v15 }
 0x79d   : > { %v2767_v62 = vmul.f32 %v2766_v7, %v2766_v7 }
 0x79f   : > { %v2768_v57 = vsel %vm849_vm2, %v2767_v62, 0.0 }
 0x7a0   : > { %2769 = vadd.xlane.f32.xlu0 %v2768_v57 }
 0x82d   : > { %v2770_v53 = vpop.xlane.xlu0 %2769 }
 0x82e   : > { %v2771_v48 = vmul.f32 0.125, %v2770_v53 }
 0x830   : > { %v2772_v20 = vadd.f32 1e-05, %v2771_v48 }
 0x832   : > { %3312 = vrsqrt.f32 %v2772_v20 }
 0x83c   : > { %v3313_v38 = vpop.eup %3312 }
 0x83d   : > { %v2774_v56 = vmul.f32 %v3313_v38, %v2766_v7 }
 0x83f   : > { %v2782_v22 = vmul.f32 %v3041_v27, %v2774_v56 }
 0x841   : > { %v2790_v25 = vadd.f32 %v3042_v36, %v2782_v22 }
 0x843   : > { %2791 = vst.msk [vmem:[%s678_s24] sm:$0xff] %vm849_vm2, %v2790_v25 }
 0x844 PF: > { %s24_s17 = sadd.s32 1, %s3353_s17   ;;  %s4537_s22 = sld [smem:[#allocation2_spill]] }
 0x845   : > { %p21_p8 = scmp.ge.s32.totalorder %s24_s17, 10   ;;  %s4538_s29 = smov %s3345_s15 }
 0x846   : > { %s4539_s30 = smov %s3349_s16  ;;  %s4540_s15 = smov %s4543_s18 }
 0x847   :  { %23 = sbr.rel (!%p21_p8) target bundleno = 4 (0x4), region = 142 }
 0x84a   : > { %s4541_s16 = smov %s4537_s22 }

</bundles_post_ra>
